<compile_context>
chip_gen: v7x
topology: tpu7x:2x2x1
jax: 0.10.0
libtpu: 0.0.40
codegen_flags: <defaults>
</compile_context>

<pallas_src>
import jax
import jax.numpy as jnp
from jax.experimental import pallas as pl
from jax.experimental.pallas import tpu as pltpu


_VMEM_LIMIT_BYTES = 32 * 1024 * 1024  # safe scoped-VMEM budget on v5e/v6e/v7x


def _cparams():
    return pltpu.CompilerParams(
        dimension_semantics=("parallel",),
        vmem_limit_bytes=_VMEM_LIMIT_BYTES,
    )


# -----------------------------------------------------------------------------
# Kernel 1: per-image conv-as-matmul    out = relu(W @ patches + b)
# -----------------------------------------------------------------------------
def _conv_kernel(w_ref, b_ref, x_ref, o_ref):
    # w_ref: (Cout, K) bf16, b_ref: (Cout, 1) f32,
    # x_ref: (K, P) bf16 (one image of patches), o_ref: (Cout, P) bf16.
    acc = jnp.dot(w_ref[...], x_ref[...], preferred_element_type=jnp.float32)
    acc = jnp.maximum(acc + b_ref[...], 0.0)          # bias + ReLU in f32
    o_ref[...] = acc.astype(o_ref.dtype)


def conv_matmul_relu(w_mat, b_col, patches):
    """w_mat: (Cout, K) bf16, b_col: (Cout, 1) f32, patches: (B, K, P) bf16
    -> (B, Cout, P) bf16  (i.e. NCHW with HW flattened)."""
    B, K, P = patches.shape
    Cout = w_mat.shape[0]
    return pl.pallas_call(
        _conv_kernel,
        out_shape=jax.ShapeDtypeStruct((B, Cout, P), jnp.bfloat16),
        grid=(B,),
        in_specs=[
            pl.BlockSpec((Cout, K), lambda b: (0, 0)),        # weights (resident)
            pl.BlockSpec((Cout, 1), lambda b: (0, 0)),        # bias    (resident)
            pl.BlockSpec((None, K, P), lambda b: (b, 0, 0)),  # one image, pipelined
        ],
        out_specs=pl.BlockSpec((None, Cout, P), lambda b: (b, 0, 0)),
        compiler_params=_cparams(),
    )(w_mat, b_col, patches)


# -----------------------------------------------------------------------------
# Kernel 2: fused head   out = sigmoid(relu(x @ W1 + b1) @ W2 + b2)
# -----------------------------------------------------------------------------
def _fc_head_kernel(x_ref, w1_ref, b1_ref, w2_ref, b2_ref, o_ref):
    # x: (TB, D) bf16, w1: (D, H) bf16, b1: (1, H) f32,
    # w2: (H, 1) bf16, b2: (1, 1) f32, o: (TB, 1) f32.
    h = jnp.dot(x_ref[...], w1_ref[...], preferred_element_type=jnp.float32)
    h = jnp.maximum(h + b1_ref[...], 0.0)                       # relu(fc1)
    y = jnp.dot(h.astype(w2_ref.dtype), w2_ref[...],
                preferred_element_type=jnp.float32) + b2_ref[...]
    o_ref[...] = (1.0 / (1.0 + jnp.exp(-y))).astype(o_ref.dtype)  # sigmoid


def fc_head(x, w1, b1, w2, b2):
    B, D = x.shape
    H = w1.shape[1]
    TB = B if B <= 256 else 256            # row tile; full batch when small
    return pl.pallas_call(
        _fc_head_kernel,
        out_shape=jax.ShapeDtypeStruct((B, 1), jnp.float32),
        grid=(pl.cdiv(B, TB),),
        in_specs=[
            pl.BlockSpec((TB, D), lambda i: (i, 0)),
            pl.BlockSpec((D, H), lambda i: (0, 0)),
            pl.BlockSpec((1, H), lambda i: (0, 0)),
            pl.BlockSpec((H, 1), lambda i: (0, 0)),
            pl.BlockSpec((1, 1), lambda i: (0, 0)),
        ],
        out_specs=pl.BlockSpec((TB, 1), lambda i: (i, 0)),
        compiler_params=_cparams(),
    )(x, w1, b1, w2, b2)


# -----------------------------------------------------------------------------
# XLA glue: im2col patch extraction (feature order (Cin, kH, kW) == torch's
# Conv2d weight.reshape(Cout, Cin*k*k) column order).
# -----------------------------------------------------------------------------
def _extract_patches(x_nchw, k, stride):
    B, C, H, W = x_nchw.shape
    Ho = (H - k) // stride + 1
    Wo = (W - k) // stride + 1
    p = jax.lax.conv_general_dilated_patches(
        x_nchw, filter_shape=(k, k), window_strides=(stride, stride),
        padding="VALID")                       # (B, C*k*k, Ho, Wo)
    return p.reshape(B, C * k * k, Ho * Wo), (Ho, Wo)


# -----------------------------------------------------------------------------
# Parameters (PyTorch layout) + one-time kernel-layout prep
# -----------------------------------------------------------------------------
def init_params(key):
    """PyTorch-layout params with PyTorch-style U(-1/sqrt(fan_in), +...) init."""
    def unif(k, shape, fan_in):
        bound = 1.0 / float(fan_in) ** 0.5
        return jax.random.uniform(k, shape, jnp.float32, -bound, bound)

    ks = jax.random.split(key, 8)
    return {
        "conv1_w": unif(ks[0], (16, 2, 8, 8), 2 * 8 * 8),
        "conv1_b": unif(ks[1], (16,), 2 * 8 * 8),
        "conv2_w": unif(ks[2], (32, 16, 5, 5), 16 * 5 * 5),
        "conv2_b": unif(ks[3], (32,), 16 * 5 * 5),
        "fc1_w": unif(ks[4], (256, 32 * 8 * 8), 32 * 8 * 8),
        "fc1_b": unif(ks[5], (256,), 32 * 8 * 8),
        "fc2_w": unif(ks[6], (1, 256), 256),
        "fc2_b": unif(ks[7], (1,), 256),
    }


def prepare_params(p):
    """One-time layout/dtype prep (done outside the forward hot path)."""
    c1o, c1i, k1, _ = p["conv1_w"].shape
    c2o, c2i, k2, _ = p["conv2_w"].shape
    return {
        "w1": p["conv1_w"].reshape(c1o, c1i * k1 * k1).astype(jnp.bfloat16),
        "b1": p["conv1_b"].reshape(c1o, 1).astype(jnp.float32),
        "w2": p["conv2_w"].reshape(c2o, c2i * k2 * k2).astype(jnp.bfloat16),
        "b2": p["conv2_b"].reshape(c2o, 1).astype(jnp.float32),
        "w_fc1": p["fc1_w"].T.astype(jnp.bfloat16),            # (2048, 256)
        "b_fc1": p["fc1_b"].reshape(1, -1).astype(jnp.float32),
        "w_fc2": p["fc2_w"].T.astype(jnp.bfloat16),            # (256, 1)
        "b_fc2": p["fc2_b"].reshape(1, -1).astype(jnp.float32),
    }


# -----------------------------------------------------------------------------
# Forward pass (matches Policy.forward)
# -----------------------------------------------------------------------------
def policy_forward(prep, x_nchw):
    """x_nchw: (B, 2, 80, 80) f32 -> (B, 1) f32 action probability."""
    B = x_nchw.shape[0]
    x = x_nchw.astype(jnp.bfloat16)

    p1, (h1h, h1w) = _extract_patches(x, k=8, stride=4)       # (B, 128, 361)
    h1 = conv_matmul_relu(prep["w1"], prep["b1"], p1)         # (B, 16, 361)
    h1 = h1.reshape(B, prep["w1"].shape[0], h1h, h1w)         # (B, 16, 19, 19) free

    p2, _ = _extract_patches(h1, k=5, stride=2)               # (B, 400, 64)
    h2 = conv_matmul_relu(prep["w2"], prep["b2"], p2)         # (B, 32, 64)

    # (B, 32, 8*8) -> (B, 2048) row-major == torch's NCHW x.view(-1, 32*8*8).
    h2_flat = h2.reshape(B, -1)
    return fc_head(h2_flat, prep["w_fc1"], prep["b_fc1"],
                   prep["w_fc2"], prep["b_fc2"])              # (B, 1) f32


# -----------------------------------------------------------------------------
# Pure-JAX f32 reference (for in-script verification only)
# -----------------------------------------------------------------------------
def reference_forward(p, x):
    def conv(x, w, b, stride):
        y = jax.lax.conv_general_dilated(
            x, w, window_strides=(stride, stride), padding="VALID",
            dimension_numbers=("NCHW", "OIHW", "NCHW"))
        return y + b[None, :, None, None]

    h = jax.nn.relu(conv(x, p["conv1_w"], p["conv1_b"], 4))
    h = jax.nn.relu(conv(h, p["conv2_w"], p["conv2_b"], 2))
    h = h.reshape(h.shape[0], -1)
    h = jax.nn.relu(h @ p["fc1_w"].T + p["fc1_b"])
    y = h @ p["fc2_w"].T + p["fc2_b"]
    return jax.nn.sigmoid(y)


if __name__ == "__main__":
    key = jax.random.PRNGKey(0)
    k_params, k_input = jax.random.split(key)

    torch_params = init_params(k_params)
    prep = prepare_params(torch_params)

    # Input must be (B, 2, 80, 80) so the flatten size equals 32*8*8.
    x = jax.random.normal(k_input, (2, 2, 80, 80), dtype=jnp.float32)

    fwd = jax.jit(policy_forward)
    out = jax.block_until_ready(fwd(prep, x))

    assert out.shape == (2, 1), out.shape
    assert bool(jnp.all((out >= 0.0) & (out <= 1.0)))

    ref = reference_forward(torch_params, x)
    max_err = float(jnp.max(jnp.abs(out - ref)))
    assert max_err < 3e-2, f"mismatch vs reference: {max_err}"

    print("KERNEL_OK")
</pallas_src>

<mosaic_0001>
module attributes {stable_mosaic.version = 11 : i64} {
  func.func @_conv_kernel(%arg0: i32, %arg1: memref<16x128xbf16, #tpu.memory_space<vmem>>, %arg2: memref<16x1xf32, #tpu.memory_space<vmem>>, %arg3: memref<1x128x361xbf16, #tpu.memory_space<vmem>>, %arg4: memref<1x16x361xbf16, #tpu.memory_space<vmem>>) attributes {dimension_semantics = [#tpu.dimension_semantics<parallel>], iteration_bounds = array<i64: 2>, scalar_prefetch = 0 : i64, scratch_operands = 0 : i64, tpu.core_type = #tpu.core_type<tc>, window_params = [{pipeline_mode = #tpu.pipeline_mode<synchronous>, transform_indices = @transform_0, window_bounds = array<i64: 16, 128>}, {pipeline_mode = #tpu.pipeline_mode<synchronous>, transform_indices = @transform_1, window_bounds = array<i64: 16, 1>}, {transform_indices = @transform_2, window_bounds = array<i64: 1, 128, 361>}, {transform_indices = @transform_3, window_bounds = array<i64: 1, 16, 361>}]} {
    %c0 = arith.constant 0 : index
    %c0_0 = arith.constant 0 : index
    %0 = vector.load %arg1[%c0, %c0_0] : memref<16x128xbf16, #tpu.memory_space<vmem>>, vector<16x128xbf16>
    %c0_1 = arith.constant 0 : index
    %c0_2 = arith.constant 0 : index
    %c0_3 = arith.constant 0 : index
    %1 = vector.load %arg3[%c0_1, %c0_2, %c0_3] : memref<1x128x361xbf16, #tpu.memory_space<vmem>>, vector<1x128x361xbf16>
    %2 = vector.shape_cast %1 : vector<1x128x361xbf16> to vector<128x361xbf16>
    %cst = arith.constant dense<0.000000e+00> : vector<16x361xf32>
    %3 = tpu.matmul %0, %2, %cst {dimension_numbers = #tpu.dot_dimension_numbers<[1], [0], [0], [1], [0, 0, 1, 1], [], []>} : vector<16x128xbf16>, vector<128x361xbf16>, vector<16x361xf32> -> vector<16x361xf32>
    %c0_4 = arith.constant 0 : index
    %c0_5 = arith.constant 0 : index
    %4 = vector.load %arg2[%c0_4, %c0_5] : memref<16x1xf32, #tpu.memory_space<vmem>>, vector<16x1xf32>
    %5 = vector.broadcast %4 : vector<16x1xf32> to vector<16x361xf32>
    %6 = arith.addf %3, %5 : vector<16x361xf32>
    %cst_6 = arith.constant 0.000000e+00 : f32
    %7 = vector.broadcast %cst_6 : f32 to vector<16x361xf32>
    %8 = arith.maximumf %6, %7 : vector<16x361xf32>
    %9 = arith.truncf %8 : vector<16x361xf32> to vector<16x361xbf16>
    %c0_7 = arith.constant 0 : index
    %c0_8 = arith.constant 0 : index
    %c0_9 = arith.constant 0 : index
    %10 = vector.load %arg4[%c0_7, %c0_8, %c0_9] : memref<1x16x361xbf16, #tpu.memory_space<vmem>>, vector<1x16x361xbf16>
    %11 = vector.shape_cast %10 : vector<1x16x361xbf16> to vector<16x361xbf16>
    %12 = vector.shape_cast %9 : vector<16x361xbf16> to vector<1x16x361xbf16>
    tpu.vector_store %arg4[%c0_7, %c0_8, %c0_9], %12 {strides = array<i32>} : memref<1x16x361xbf16, #tpu.memory_space<vmem>>, vector<1x16x361xbf16>,
    return
  }
  func.func @transform_0(%arg0: i32) -> (i32, i32) {
    %c0_i32 = arith.constant 0 : i32
    %c0_i32_0 = arith.constant 0 : i32
    %c0_i32_1 = arith.constant 0 : i32
    return %c0_i32, %c0_i32_0 : i32, i32
  }
  func.func @transform_1(%arg0: i32) -> (i32, i32) {
    %c0_i32 = arith.constant 0 : i32
    %c0_i32_0 = arith.constant 0 : i32
    %c0_i32_1 = arith.constant 0 : i32
    return %c0_i32, %c0_i32_0 : i32, i32
  }
  func.func @transform_2(%arg0: i32) -> (i32, i32, i32) {
    %c0_i32 = arith.constant 0 : i32
    %c0_i32_0 = arith.constant 0 : i32
    %c0_i32_1 = arith.constant 0 : i32
    return %arg0, %c0_i32, %c0_i32_0 : i32, i32, i32
  }
  func.func @transform_3(%arg0: i32) -> (i32, i32, i32) {
    %c0_i32 = arith.constant 0 : i32
    %c0_i32_0 = arith.constant 0 : i32
    %c0_i32_1 = arith.constant 0 : i32
    return %arg0, %c0_i32, %c0_i32_0 : i32, i32, i32
  }
}

module attributes {stable_mosaic.version = 11 : i64} {
  func.func @_conv_kernel(%arg0: i32, %arg1: memref<32x400xbf16, #tpu.memory_space<vmem>>, %arg2: memref<32x1xf32, #tpu.memory_space<vmem>>, %arg3: memref<1x400x64xbf16, #tpu.memory_space<vmem>>, %arg4: memref<1x32x64xbf16, #tpu.memory_space<vmem>>) attributes {dimension_semantics = [#tpu.dimension_semantics<parallel>], iteration_bounds = array<i64: 2>, scalar_prefetch = 0 : i64, scratch_operands = 0 : i64, tpu.core_type = #tpu.core_type<tc>, window_params = [{pipeline_mode = #tpu.pipeline_mode<synchronous>, transform_indices = @transform_0, window_bounds = array<i64: 32, 400>}, {pipeline_mode = #tpu.pipeline_mode<synchronous>, transform_indices = @transform_1, window_bounds = array<i64: 32, 1>}, {transform_indices = @transform_2, window_bounds = array<i64: 1, 400, 64>}, {transform_indices = @transform_3, window_bounds = array<i64: 1, 32, 64>}]} {
    %c0 = arith.constant 0 : index
    %c0_0 = arith.constant 0 : index
    %0 = vector.load %arg1[%c0, %c0_0] : memref<32x400xbf16, #tpu.memory_space<vmem>>, vector<32x400xbf16>
    %c0_1 = arith.constant 0 : index
    %c0_2 = arith.constant 0 : index
    %c0_3 = arith.constant 0 : index
    %1 = vector.load %arg3[%c0_1, %c0_2, %c0_3] : memref<1x400x64xbf16, #tpu.memory_space<vmem>>, vector<1x400x64xbf16>
    %2 = vector.shape_cast %1 : vector<1x400x64xbf16> to vector<400x64xbf16>
    %cst = arith.constant dense<0.000000e+00> : vector<32x64xf32>
    %3 = tpu.matmul %0, %2, %cst {dimension_numbers = #tpu.dot_dimension_numbers<[1], [0], [0], [1], [0, 0, 1, 1], [], []>} : vector<32x400xbf16>, vector<400x64xbf16>, vector<32x64xf32> -> vector<32x64xf32>
    %c0_4 = arith.constant 0 : index
    %c0_5 = arith.constant 0 : index
    %4 = vector.load %arg2[%c0_4, %c0_5] : memref<32x1xf32, #tpu.memory_space<vmem>>, vector<32x1xf32>
    %5 = vector.broadcast %4 : vector<32x1xf32> to vector<32x64xf32>
    %6 = arith.addf %3, %5 : vector<32x64xf32>
    %cst_6 = arith.constant 0.000000e+00 : f32
    %7 = vector.broadcast %cst_6 : f32 to vector<32x64xf32>
    %8 = arith.maximumf %6, %7 : vector<32x64xf32>
    %9 = arith.truncf %8 : vector<32x64xf32> to vector<32x64xbf16>
    %c0_7 = arith.constant 0 : index
    %c0_8 = arith.constant 0 : index
    %c0_9 = arith.constant 0 : index
    %10 = vector.load %arg4[%c0_7, %c0_8, %c0_9] : memref<1x32x64xbf16, #tpu.memory_space<vmem>>, vector<1x32x64xbf16>
    %11 = vector.shape_cast %10 : vector<1x32x64xbf16> to vector<32x64xbf16>
    %12 = vector.shape_cast %9 : vector<32x64xbf16> to vector<1x32x64xbf16>
    tpu.vector_store %arg4[%c0_7, %c0_8, %c0_9], %12 {strides = array<i32>} : memref<1x32x64xbf16, #tpu.memory_space<vmem>>, vector<1x32x64xbf16>,
    return
  }
  func.func @transform_0(%arg0: i32) -> (i32, i32) {
    %c0_i32 = arith.constant 0 : i32
    %c0_i32_0 = arith.constant 0 : i32
    %c0_i32_1 = arith.constant 0 : i32
    return %c0_i32, %c0_i32_0 : i32, i32
  }
  func.func @transform_1(%arg0: i32) -> (i32, i32) {
    %c0_i32 = arith.constant 0 : i32
    %c0_i32_0 = arith.constant 0 : i32
    %c0_i32_1 = arith.constant 0 : i32
    return %c0_i32, %c0_i32_0 : i32, i32
  }
  func.func @transform_2(%arg0: i32) -> (i32, i32, i32) {
    %c0_i32 = arith.constant 0 : i32
    %c0_i32_0 = arith.constant 0 : i32
    %c0_i32_1 = arith.constant 0 : i32
    return %arg0, %c0_i32, %c0_i32_0 : i32, i32, i32
  }
  func.func @transform_3(%arg0: i32) -> (i32, i32, i32) {
    %c0_i32 = arith.constant 0 : i32
    %c0_i32_0 = arith.constant 0 : i32
    %c0_i32_1 = arith.constant 0 : i32
    return %arg0, %c0_i32, %c0_i32_0 : i32, i32, i32
  }
}

module attributes {stable_mosaic.version = 11 : i64} {
  func.func @_fc_head_kernel(%arg0: i32, %arg1: memref<2x2048xbf16, #tpu.memory_space<vmem>>, %arg2: memref<2048x256xbf16, #tpu.memory_space<vmem>>, %arg3: memref<1x256xf32, #tpu.memory_space<vmem>>, %arg4: memref<256x1xbf16, #tpu.memory_space<vmem>>, %arg5: memref<1x1xf32, #tpu.memory_space<vmem>>, %arg6: memref<2x1xf32, #tpu.memory_space<vmem>>) attributes {dimension_semantics = [#tpu.dimension_semantics<parallel>], iteration_bounds = array<i64: 1>, scalar_prefetch = 0 : i64, scratch_operands = 0 : i64, tpu.core_type = #tpu.core_type<tc>, window_params = [{transform_indices = @transform_0, window_bounds = array<i64: 2, 2048>}, {pipeline_mode = #tpu.pipeline_mode<synchronous>, transform_indices = @transform_1, window_bounds = array<i64: 2048, 256>}, {pipeline_mode = #tpu.pipeline_mode<synchronous>, transform_indices = @transform_2, window_bounds = array<i64: 1, 256>}, {pipeline_mode = #tpu.pipeline_mode<synchronous>, transform_indices = @transform_3, window_bounds = array<i64: 256, 1>}, {pipeline_mode = #tpu.pipeline_mode<synchronous>, transform_indices = @transform_4, window_bounds = array<i64: 1, 1>}, {transform_indices = @transform_5, window_bounds = array<i64: 2, 1>}]} {
    %c0 = arith.constant 0 : index
    %c0_0 = arith.constant 0 : index
    %0 = vector.load %arg1[%c0, %c0_0] : memref<2x2048xbf16, #tpu.memory_space<vmem>>, vector<2x2048xbf16>
    %c0_1 = arith.constant 0 : index
    %c0_2 = arith.constant 0 : index
    %1 = vector.load %arg2[%c0_1, %c0_2] : memref<2048x256xbf16, #tpu.memory_space<vmem>>, vector<2048x256xbf16>
    %cst = arith.constant dense<0.000000e+00> : vector<2x256xf32>
    %2 = tpu.matmul %0, %1, %cst {dimension_numbers = #tpu.dot_dimension_numbers<[1], [0], [0], [1], [0, 0, 1, 1], [], []>} : vector<2x2048xbf16>, vector<2048x256xbf16>, vector<2x256xf32> -> vector<2x256xf32>
    %c0_3 = arith.constant 0 : index
    %c0_4 = arith.constant 0 : index
    %3 = vector.load %arg3[%c0_3, %c0_4] : memref<1x256xf32, #tpu.memory_space<vmem>>, vector<1x256xf32>
    %4 = vector.broadcast %3 : vector<1x256xf32> to vector<2x256xf32>
    %5 = arith.addf %2, %4 : vector<2x256xf32>
    %cst_5 = arith.constant 0.000000e+00 : f32
    %6 = vector.broadcast %cst_5 : f32 to vector<2x256xf32>
    %7 = arith.maximumf %5, %6 : vector<2x256xf32>
    %8 = arith.truncf %7 : vector<2x256xf32> to vector<2x256xbf16>
    %c0_6 = arith.constant 0 : index
    %c0_7 = arith.constant 0 : index
    %9 = vector.load %arg4[%c0_6, %c0_7] : memref<256x1xbf16, #tpu.memory_space<vmem>>, vector<256x1xbf16>
    %cst_8 = arith.constant dense<0.000000e+00> : vector<2x1xf32>
    %10 = tpu.matmul %8, %9, %cst_8 {dimension_numbers = #tpu.dot_dimension_numbers<[1], [0], [0], [1], [0, 0, 1, 1], [], []>} : vector<2x256xbf16>, vector<256x1xbf16>, vector<2x1xf32> -> vector<2x1xf32>
    %c0_9 = arith.constant 0 : index
    %c0_10 = arith.constant 0 : index
    %11 = vector.load %arg5[%c0_9, %c0_10] : memref<1x1xf32, #tpu.memory_space<vmem>>, vector<1x1xf32>
    %12 = vector.broadcast %11 : vector<1x1xf32> to vector<2x1xf32>
    %13 = arith.addf %10, %12 : vector<2x1xf32>
    %cst_11 = arith.constant 0.000000e+00 : f32
    %14 = vector.broadcast %cst_11 : f32 to vector<2x1xf32>
    %15 = arith.subf %14, %13 : vector<2x1xf32>
    %16 = math.exp %15 : vector<2x1xf32>
    %cst_12 = arith.constant 1.000000e+00 : f32
    %17 = vector.broadcast %cst_12 : f32 to vector<2x1xf32>
    %18 = arith.addf %17, %16 : vector<2x1xf32>
    %cst_13 = arith.constant 1.000000e+00 : f32
    %19 = vector.broadcast %cst_13 : f32 to vector<2x1xf32>
    %20 = arith.divf %19, %18 : vector<2x1xf32>
    %c0_14 = arith.constant 0 : index
    %c0_15 = arith.constant 0 : index
    %21 = vector.load %arg6[%c0_14, %c0_15] : memref<2x1xf32, #tpu.memory_space<vmem>>, vector<2x1xf32>
    tpu.vector_store %arg6[%c0_14, %c0_15], %20 {strides = array<i32>} : memref<2x1xf32, #tpu.memory_space<vmem>>, vector<2x1xf32>,
    return
  }
  func.func @transform_0(%arg0: i32) -> (i32, i32) {
    %c0_i32 = arith.constant 0 : i32
    %c0_i32_0 = arith.constant 0 : i32
    return %arg0, %c0_i32 : i32, i32
  }
  func.func @transform_1(%arg0: i32) -> (i32, i32) {
    %c0_i32 = arith.constant 0 : i32
    %c0_i32_0 = arith.constant 0 : i32
    %c0_i32_1 = arith.constant 0 : i32
    return %c0_i32, %c0_i32_0 : i32, i32
  }
  func.func @transform_2(%arg0: i32) -> (i32, i32) {
    %c0_i32 = arith.constant 0 : i32
    %c0_i32_0 = arith.constant 0 : i32
    %c0_i32_1 = arith.constant 0 : i32
    return %c0_i32, %c0_i32_0 : i32, i32
  }
  func.func @transform_3(%arg0: i32) -> (i32, i32) {
    %c0_i32 = arith.constant 0 : i32
    %c0_i32_0 = arith.constant 0 : i32
    %c0_i32_1 = arith.constant 0 : i32
    return %c0_i32, %c0_i32_0 : i32, i32
  }
  func.func @transform_4(%arg0: i32) -> (i32, i32) {
    %c0_i32 = arith.constant 0 : i32
    %c0_i32_0 = arith.constant 0 : i32
    %c0_i32_1 = arith.constant 0 : i32
    return %c0_i32, %c0_i32_0 : i32, i32
  }
  func.func @transform_5(%arg0: i32) -> (i32, i32) {
    %c0_i32 = arith.constant 0 : i32
    %c0_i32_0 = arith.constant 0 : i32
    return %arg0, %c0_i32 : i32, i32
  }
}

</mosaic_0001>

<bundles_post_ra>
// kernel: policy_forward.3
= control target key start
LH: loop header
LB: loop body
LE: loop exit
PB: predicated region body
PF: predicated region fallthrough
CT: control target
= control target key end

     0   :  { %s671_s12 = smov 0   ;;  %s736_s0 = inlined_call_operand.vmem [shape: bf16[16,128], index: 0, kind: input, shape index: {}]   ;;  %s737_s1 = inlined_call_operand.vmem [shape: f32[16,1], index: 1, kind: input, shape index: {}]   ;;  %s738_s2 = inlined_call_operand.vmem [shape: bf16[2,128,361], index: 2, kind: input, shape index: {}]   ;;  %s739_s3 = inlined_call_operand.vmem [shape: bf16[2,16,361], index: 3, kind: output, shape index: {}]  }
   0x1 LB: > { %s522_s13 = sadd.s32 4294967295, %s646_s12   ;;  %p526_p0 = scmp.ge.s32.totalorder %s646_s12, 1  ;;  %s646_s12 = sphi %s671_s12, %s13_s12  }
   0x2   : > { %p137_p1 = scmp.lt.s32.totalorder %s646_s12, 3 }
   0x4   : > { %p138_p2 = pnand %p526_p0, %p137_p1 }
   0x5   : > { %p161_p3 = scmp.lt.s32.totalorder (!%p138_p2), %s522_s13, 1  ;;  %v648_v0 = vmov (!%p138_p2), 0.0   ;;  %vm649_vm0 = vmmov (!%p138_p2), 0   ;;  %v206_v1 = vld [vmem:[%s737_s1] sm:$0xff] (!%p138_p2)  ;;  %v650_v2 = vmov (!%p138_p2), 0   ;;  %v207_v3 = vld [vmem:[%s737_s1 + $0x8] sm:$0xff] (!%p138_p2) }
   0x6   : > { %141 = sbr.rel (%p138_p2) target bundleno = 272 (0x110), region = 32  ;;  %573 = vmatprep.subr.bf16.mxu1 (!%p138_p2), %v648_v0  ;;  %589 = vmatprep.mubr.msk.bf16.mxu1 (!%p138_p2), %vm649_vm0, %v648_v0  ;;  %v639_v28 = vld [vmem:[%s736_s0] sm:$0xff] (!%p138_p2)   ;;  %vm463_vm1 = vcmask (!%p138_p2), 855040  }
   0x7   : > { %384 = vmatprep.mubr.bf16.mxu0 (!%p138_p2), %v650_v2  ;;  %606 = vset.pattern.permute.xlu0 (!%p138_p2), %v650_v2 }
   0x8   : > { %210 = vperm.xlu0 (!%p138_p2), %606, %v206_v1  }
   0xc   : > { %215 = vperm.xlu0 (!%p138_p2), %606, %v207_v3  }
   0xd   : > { %s741_s13 = smov (!%p161_p3, %s522_s13), 1 }
   0xe   : > { %s593_s16 = smul.u32 192, %s741_s13 }
   0xf   : > { %s594_s24 = smul.u32 24, %s741_s13 }
  0x10   : > { %s693_s21 = scalar_lea.vmem %s738_s2, %s593_s16 }
  0x11   : > { %v607_v4 = vld [vmem:[%s693_s21 + $0x4] ss:$12 sps:$4 sm:$0xff]   ;;  %v609_v5 = vld [vmem:[%s693_s21 + $0x8] ss:$12 sps:$4 sm:$0xff]   ;;  %v610_v6 = vld [vmem:[%s693_s21] ss:$12 sps:$4 sm:$0xff]   ;;  %s170_s27 = scalar_lea.vmem %s739_s3, %s594_s24 }
  0x12   : > { %352 = vmatprep.subr.bf16.mxu0 %v607_v4  ;;  %574 = vmatpush3.bf16.msra.mxu1 %v609_v5  ;;  %v611_v7 = vld [vmem:[%s693_s21 + $0x1c] ss:$12 sps:$4 sm:$0xff]   ;;  %v613_v8 = vld [vmem:[%s693_s21 + $0x20] ss:$12 sps:$4 sm:$0xff]   ;;  %v614_v9 = vld [vmem:[%s693_s21 + $0x18] ss:$12 sps:$4 sm:$0xff]  }
  0x13   : > { %353 = vmatpush1.bf16.msra.mxu0 %v610_v6  ;;  %575 = vmatprep.subr.bf16.mxu1 %v648_v0  ;;  %v615_v10 = vld [vmem:[%s693_s21 + $0x34] ss:$12 sps:$4 sm:$0xff]   ;;  %v617_v11 = vld [vmem:[%s693_s21 + $0x38] ss:$12 sps:$4 sm:$0xff]   ;;  %v618_v12 = vld [vmem:[%s693_s21 + $0x30] ss:$12 sps:$4 sm:$0xff]  }
  0x14   : > { %354 = vmatprep.subr.bf16.mxu0 %v611_v7  ;;  %v619_v13 = vld [vmem:[%s693_s21 + $0x4c] ss:$12 sps:$4 sm:$0xff]   ;;  %v621_v14 = vld [vmem:[%s693_s21 + $0x50] ss:$12 sps:$4 sm:$0xff]   ;;  %v622_v15 = vld [vmem:[%s693_s21 + $0x48] ss:$12 sps:$4 sm:$0xff]  }
  0x15   : > { %v623_v16 = vld [vmem:[%s693_s21 + $0x64] ss:$12 sps:$4 sm:$0xff]   ;;  %v625_v17 = vld [vmem:[%s693_s21 + $0x68] ss:$12 sps:$4 sm:$0xff]   ;;  %v626_v18 = vld [vmem:[%s693_s21 + $0x60] ss:$12 sps:$4 sm:$0xff]  }
  0x16   : > { %576 = vmatpush3.bf16.msra.mxu1 %v613_v8  ;;  %v627_v19 = vld [vmem:[%s693_s21 + $0x7c] ss:$12 sps:$4 sm:$0xff]   ;;  %v629_v20 = vld [vmem:[%s693_s21 + $0x80] ss:$12 sps:$4 sm:$0xff]   ;;  %v630_v21 = vld [vmem:[%s693_s21 + $0x78] ss:$12 sps:$4 sm:$0xff]  }
  0x17   : > { %355 = vmatpush1.bf16.msra.mxu0 %v614_v9  ;;  %577 = vmatprep.subr.bf16.mxu1 %v648_v0  ;;  %v631_v22 = vld [vmem:[%s693_s21 + $0x94] ss:$12 sps:$4 sm:$0xff]   ;;  %v633_v23 = vld [vmem:[%s693_s21 + $0x98] ss:$12 sps:$4 sm:$0xff]   ;;  %v634_v24 = vld [vmem:[%s693_s21 + $0x90] ss:$12 sps:$4 sm:$0xff]  }
  0x18   : > { %356 = vmatprep.subr.bf16.mxu0 %v615_v10  ;;  %v635_v25 = vld [vmem:[%s693_s21 + $0xac] ss:$12 sps:$4 sm:$0xff]   ;;  %v637_v26 = vld [vmem:[%s693_s21 + $0xb0] ss:$12 sps:$4 sm:$0xff]   ;;  %v638_v27 = vld [vmem:[%s693_s21 + $0xa8] ss:$12 sps:$4 sm:$0xff]  }
  0x1a   : > { %578 = vmatpush3.bf16.msra.mxu1 %v617_v11 }
  0x1b   : > { %357 = vmatpush1.bf16.msra.mxu0 %v618_v12  ;;  %579 = vmatprep.subr.bf16.mxu1 %v648_v0 }
  0x1c   : > { %358 = vmatprep.subr.bf16.mxu0 %v619_v13 }
  0x1e   : > { %580 = vmatpush3.bf16.msra.mxu1 %v621_v14 }
  0x1f   : > { %359 = vmatpush1.bf16.msra.mxu0 %v622_v15  ;;  %581 = vmatprep.subr.bf16.mxu1 %v648_v0 }
  0x20   : > { %360 = vmatprep.subr.bf16.mxu0 %v623_v16 }
  0x22   : > { %582 = vmatpush3.bf16.msra.mxu1 %v625_v17 }
  0x23   : > { %361 = vmatpush1.bf16.msra.mxu0 %v626_v18  ;;  %583 = vmatprep.subr.bf16.mxu1 %v648_v0 }
  0x24   : > { %362 = vmatprep.subr.bf16.mxu0 %v627_v19 }
  0x26   : > { %584 = vmatpush3.bf16.msra.mxu1 %v629_v20 }
  0x27   : > { %363 = vmatpush1.bf16.msra.mxu0 %v630_v21  ;;  %585 = vmatprep.subr.bf16.mxu1 %v648_v0 }
  0x28   : > { %364 = vmatprep.subr.bf16.mxu0 %v631_v22 }
  0x2a   : > { %586 = vmatpush3.bf16.msra.mxu1 %v633_v23 }
  0x2b   : > { %365 = vmatpush1.bf16.msra.mxu0 %v634_v24  ;;  %587 = vmatprep.subr.bf16.mxu1 %v648_v0 }
  0x2c   : > { %366 = vmatprep.subr.bf16.mxu0 %v635_v25 }
  0x2e   : > { %588 = vmatpush3.bf16.msra.mxu1 %v637_v26 }
  0x2f   : > { %367 = vmatpush1.bf16.msra.mxu0 %v638_v27 }
  0x31   : > { %590 = vmatmul.mubr.bf16.vlgmr.msra.gmra.mrb[0].mxu1 %v639_v28 }
  0x32   : > { %385 = vmatmul.mubr.bf16.vlgmr.msra.gmra.mrb[0].mxu0 %v639_v28 }
  0x87   : > { %v211_v29 = vpop.permute.xlu0 %210 }
  0x8b   : > { %v216_v30 = vpop.permute.xlu0 %215 }
 0x104   : > { %v429_v31 = vpop.f32.mrb[0].mxu1 }
 0x105   : > { %v430_v32 = vadd.f32 %v429_v31, %v211_v29  ;;  %v386_v33 = vpop.f32.mrb[0].mxu0  ;;  %v591_v34 = vpop.f32.mrb[1].mxu1 }
 0x106   : > { %v387_v35 = vadd.f32 %v386_v33, %v211_v29  ;;  %v388_v36 = vpop.f32.mrb[1].mxu0  ;;  %v432_v37 = vpop.f32.mrb[2].mxu1 }
 0x107   : > { %v438_v38 = vmax.f32 %v430_v32, 0.0  ;;  %v389_v39 = vadd.f32 %v388_v36, %v211_v29  ;;  %v433_v40 = vadd.f32 %v432_v37, %v216_v30  ;;  %v390_v41 = vpop.f32.mrb[2].mxu0  ;;  %v592_v42 = vpop.f32.mrb[3].mxu1 }
 0x108   : > { %v436_v43 = vmax.f32 %v387_v35, 0.0  ;;  %v391_v44 = vadd.f32 %v390_v41, %v216_v30  ;;  %v392_v45 = vpop.f32.mrb[3].mxu0 }
 0x109   : > { %v561_v46 = vpack.c.bf16 %v438_v38, %v438_v38  ;;  %v437_v47 = vmax.f32 %v389_v39, 0.0  ;;  %v441_v48 = vmax.f32 %v433_v40, 0.0  ;;  %v393_v49 = vadd.f32 %v392_v45, %v216_v30 }
 0x10a   : > { %v439_v50 = vmax.f32 %v391_v44, 0.0 }
 0x10b   : > { %464 = vst.msk [vmem:[%s170_s27 + $0x8] sm:$0xf] %vm463_vm1, %v561_v46  ;;  %v560_v51 = vpack.c.bf16 %v437_v47, %v436_v43  ;;  %v563_v52 = vpack.c.bf16 %v441_v48, %v441_v48  ;;  %v440_v53 = vmax.f32 %v393_v49, 0.0 }
 0x10d   : > { %462 = vst [vmem:[%s170_s27] sm:$0xff] %v560_v51  ;;  %466 = vst.msk [vmem:[%s170_s27 + $0x14] sm:$0xf] %vm463_vm1, %v563_v52  ;;  %v562_v54 = vpack.c.bf16 %v440_v53, %v439_v50 }
 0x10f   : > { %465 = vst [vmem:[%s170_s27 + $0xc] sm:$0xff] %v562_v54 }
 0x110 PF: > { %s13_s12 = sadd.s32 1, %s646_s12  }
 0x111   : > { %p10_p4 = scmp.ge.s32.totalorder %s13_s12, 4  }
 0x113   :  { %12 = sbr.rel (!%p10_p4) target bundleno = 1 (0x1), region = 62 }

// kernel: policy_forward.4
= control target key start
LH: loop header
LB: loop body
LE: loop exit
PB: predicated region body
PF: predicated region fallthrough
CT: control target
= control target key end

     0   :  { %s787_s12 = smov 0   ;;  %s888_s0 = inlined_call_operand.vmem [shape: bf16[32,400], index: 0, kind: input, shape index: {}]   ;;  %s889_s1 = inlined_call_operand.vmem [shape: f32[32,1], index: 1, kind: input, shape index: {}]   ;;  %s890_s2 = inlined_call_operand.vmem [shape: bf16[2,400,64], index: 2, kind: input, shape index: {}]   ;;  %s891_s3 = inlined_call_operand.vmem [shape: bf16[2,32,64], index: 3, kind: output, shape index: {}]  }
   0x1 LB: > { %s627_s13 = sadd.s32 4294967295, %s764_s12   ;;  %p631_p0 = scmp.ge.s32.totalorder %s764_s12, 1  ;;  %s764_s12 = sphi %s787_s12, %s13_s12  }
   0x2   : > { %p137_p1 = scmp.lt.s32.totalorder %s764_s12, 3 }
   0x4   : > { %p138_p2 = pnand %p631_p0, %p137_p1 }
   0x5   : > { %p161_p3 = scmp.lt.s32.totalorder (!%p138_p2), %s627_s13, 1  ;;  %v766_v0 = vmov (!%p138_p2), 0   ;;  %v747_v1 = vld [vmem:[%s888_s0 + $0x4] ss:$16 sps:$4 sm:$0xff] (!%p138_p2)   ;;  %vm442_vm0 = vcmask (!%p138_p2), 130048   ;;  %v231_v5 = vld [vmem:[%s889_s1 + $0x8] sm:$0xff] (!%p138_p2) }
   0x6   : > { %141 = sbr.rel (%p138_p2) target bundleno = 285 (0x11d), region = 32  ;;  %498 = vmatprep.subr.bf16.mxu1 (!%p138_p2), %v766_v0  ;;  %719 = vset.pattern.permute.xlu0 (!%p138_p2), %v766_v0  ;;  %v751_v2 = vld [vmem:[%s888_s0 + $0xc] ss:$16 sps:$4 sm:$0xff] (!%p138_p2)   ;;  %v230_v3 = vld [vmem:[%s889_s1] sm:$0xff] (!%p138_p2)  ;;  %v232_v4 = vld [vmem:[%s889_s1 + $0x10] sm:$0xff] (!%p138_p2)  ;;  %vm567_vm1 = vcmask (!%p138_p2), 519168  }
   0x7   : > { %720 = vset.pattern.permute.xlu1 (!%p138_p2), %v766_v0  ;;  %481 = vmatprep.mubr.bf16.mxu0 (!%p138_p2), %v747_v1  ;;  %v233_v7 = vld [vmem:[%s889_s1 + $0x18] sm:$0xff] (!%p138_p2)  ;;  %v745_v31 = vld [vmem:[%s888_s0] ss:$16 sps:$4 sm:$0xff] (!%p138_p2)   ;;  %v752_v33 = vld [vmem:[%s888_s0 + $0x24] ss:$16 sps:$4 sm:$0xff] (!%p138_p2)  }
   0x8   : > { %668 = vmatprep.mubr.msk.bf16.mxu1 (!%p138_p2), %vm442_vm0, %v751_v2  ;;  %236 = vperm.xlu0 (!%p138_p2), %719, %v230_v3   ;;  %v749_v34 = vld [vmem:[%s888_s0 + $0x8] ss:$16 sps:$4 sm:$0xff] (!%p138_p2)   ;;  %v755_v35 = vld [vmem:[%s888_s0 + $0x2c] ss:$16 sps:$4 sm:$0xff] (!%p138_p2)   ;;  %v754_v36 = vld [vmem:[%s888_s0 + $0x20] ss:$16 sps:$4 sm:$0xff] (!%p138_p2)  }
   0x9   : > { %246 = vperm.xlu1 (!%p138_p2), %720, %v232_v4   ;;  %v757_v37 = vld [vmem:[%s888_s0 + $0x28] ss:$16 sps:$4 sm:$0xff] (!%p138_p2)  }
   0xc   : > { %241 = vperm.xlu0 (!%p138_p2), %719, %v231_v5  }
   0xd   : > { %s893_s13 = smov (!%p161_p3, %s627_s13), 1  ;;  %251 = vperm.xlu1 %720, %v233_v7  }
   0xe   : > { %s709_s18 = smul.u32 200, %s893_s13  ;;  %s676_s17 = sshll.u32 %s893_s13, 4 }
   0xf   : > { %s170_s20 = scalar_lea.vmem %s891_s3, %s676_s17 }
  0x10   : > { %s817_s25 = scalar_lea.vmem %s890_s2, %s709_s18 }
  0x11   : > { %v721_v6 = vld [vmem:[%s817_s25 + $0x40] sm:$0xff]   ;;  %v724_v10 = vld [vmem:[%s817_s25 + $0x48] sm:$0xff]   ;;  %v727_v13 = vld [vmem:[%s817_s25 + $0x50] sm:$0xff]  }
  0x12   : > { %v722_v8 = vld [vmem:[%s817_s25 + $0x80] sm:$0xff]   ;;  %681 = vmatprep.subr.bf16.mxu0 %v721_v6  ;;  %v725_v11 = vld [vmem:[%s817_s25 + $0x88] sm:$0xff]   ;;  %v728_v14 = vld [vmem:[%s817_s25 + $0x90] sm:$0xff]  }
  0x13   : > { %v723_v9 = vld [vmem:[%s817_s25] sm:$0xff]   ;;  %499 = vmatpush1.bf16.msra.mxu1 %v722_v8  ;;  %v726_v12 = vld [vmem:[%s817_s25 + $0x8] sm:$0xff]   ;;  %v729_v15 = vld [vmem:[%s817_s25 + $0x10] sm:$0xff]  }
  0x14   : > { %682 = vmatpush3.bf16.msra.mxu0 %v723_v9  ;;  %500 = vmatprep.subr.bf16.mxu1 %v766_v0  ;;  %v730_v16 = vld [vmem:[%s817_s25 + $0x58] sm:$0xff]   ;;  %v733_v19 = vld [vmem:[%s817_s25 + $0x60] sm:$0xff]   ;;  %v736_v22 = vld [vmem:[%s817_s25 + $0x68] sm:$0xff]  }
  0x15   : > { %683 = vmatprep.subr.bf16.mxu0 %v724_v10  ;;  %v731_v17 = vld [vmem:[%s817_s25 + $0x98] sm:$0xff]   ;;  %v734_v20 = vld [vmem:[%s817_s25 + $0xa0] sm:$0xff]   ;;  %v737_v23 = vld [vmem:[%s817_s25 + $0xa8] sm:$0xff]  }
  0x16   : > { %v732_v18 = vld [vmem:[%s817_s25 + $0x18] sm:$0xff]   ;;  %v735_v21 = vld [vmem:[%s817_s25 + $0x20] sm:$0xff]   ;;  %v738_v24 = vld [vmem:[%s817_s25 + $0x28] sm:$0xff]  }
  0x17   : > { %501 = vmatpush1.bf16.msra.mxu1 %v725_v11  ;;  %v739_v25 = vld [vmem:[%s817_s25 + $0x70] sm:$0xff]   ;;  %v742_v28 = vld [vmem:[%s817_s25 + $0x78] sm:$0xff]   ;;  %v748_v32 = vld [vmem:[%s817_s25 + $0xc0] sm:$0xff]  }
  0x18   : > { %684 = vmatpush3.bf16.msra.mxu0 %v726_v12  ;;  %502 = vmatprep.subr.bf16.mxu1 %v766_v0  ;;  %v740_v26 = vld [vmem:[%s817_s25 + $0xb0] sm:$0xff]   ;;  %v743_v29 = vld [vmem:[%s817_s25 + $0xb8] sm:$0xff]  }
  0x19   : > { %685 = vmatprep.subr.bf16.mxu0 %v727_v13  ;;  %v741_v27 = vld [vmem:[%s817_s25 + $0x30] sm:$0xff]   ;;  %v744_v30 = vld [vmem:[%s817_s25 + $0x38] sm:$0xff]  }
  0x1b   : > { %503 = vmatpush1.bf16.msra.mxu1 %v728_v14 }
  0x1c   : > { %686 = vmatpush3.bf16.msra.mxu0 %v729_v15  ;;  %504 = vmatprep.subr.bf16.mxu1 %v766_v0 }
  0x1d   : > { %687 = vmatprep.subr.bf16.mxu0 %v730_v16 }
  0x1f   : > { %505 = vmatpush1.bf16.msra.mxu1 %v731_v17 }
  0x20   : > { %688 = vmatpush3.bf16.msra.mxu0 %v732_v18  ;;  %506 = vmatprep.subr.bf16.mxu1 %v766_v0 }
  0x21   : > { %689 = vmatprep.subr.bf16.mxu0 %v733_v19 }
  0x23   : > { %507 = vmatpush1.bf16.msra.mxu1 %v734_v20 }
  0x24   : > { %690 = vmatpush3.bf16.msra.mxu0 %v735_v21  ;;  %508 = vmatprep.subr.bf16.mxu1 %v766_v0 }
  0x25   : > { %691 = vmatprep.subr.bf16.mxu0 %v736_v22 }
  0x27   : > { %509 = vmatpush1.bf16.msra.mxu1 %v737_v23 }
  0x28   : > { %692 = vmatpush3.bf16.msra.mxu0 %v738_v24  ;;  %510 = vmatprep.subr.bf16.mxu1 %v766_v0 }
  0x29   : > { %693 = vmatprep.subr.bf16.mxu0 %v739_v25 }
  0x2b   : > { %511 = vmatpush1.bf16.msra.mxu1 %v740_v26 }
  0x2c   : > { %694 = vmatpush3.bf16.msra.mxu0 %v741_v27  ;;  %512 = vmatprep.subr.bf16.mxu1 %v766_v0 }
  0x2d   : > { %695 = vmatprep.subr.bf16.mxu0 %v742_v28 }
  0x2f   : > { %513 = vmatpush1.bf16.msra.mxu1 %v743_v29 }
  0x30   : > { %696 = vmatpush3.bf16.msra.mxu0 %v744_v30  ;;  %514 = vmatprep.subr.bf16.mxu1 %v766_v0 }
  0x33   : > { %482 = vmatmul.mubr.bf16.vlgmr.msra.gmra.mrb[0].mxu0 %v745_v31  ;;  %515 = vmatpush1.bf16.msra.mxu1 %v748_v32 }
  0x34   : > { %489 = vmatprep.mubr.bf16.mxu0 %v752_v33 }
  0x36   : > { %531 = vmatmul.mubr.bf16.vlgmr.msra.gmra.mrb[0].mxu1 %v749_v34 }
  0x37   : > { %669 = vmatprep.mubr.msk.bf16.mxu1 %vm442_vm0, %v755_v35 }
  0x3b   : > { %490 = vmatmul.mubr.bf16.gmra.mrb[4].mxu0 %v754_v36 }
  0x3e   : > { %539 = vmatmul.mubr.bf16.gmra.mrb[4].mxu1 %v757_v37 }
  0x87   : > { %v237_v38 = vpop.permute.xlu0 %236 }
  0x88   : > { %v247_v53 = vpop.permute.xlu1 %246 }
  0x8b   : > { %v242_v43 = vpop.permute.xlu0 %241 }
  0x8c   : > { %v252_v4 = vpop.permute.xlu1 %251 }
 0x106   : > { %v697_v39 = vpop.f32.mrb[0].mxu0 }
 0x107   : > { %v698_v40 = vpop.f32.mrb[1].mxu0 }
 0x108   : > { %v699_v41 = vadd.f32 %v698_v40, %v697_v39  ;;  %v700_v42 = vpop.f32.mrb[2].mxu0 }
 0x109   : > { %v701_v44 = vpop.f32.mrb[3].mxu0  ;;  %v532_v45 = vpop.f32.mrb[0].mxu1 }
 0x10a   : > { %v702_v46 = vadd.f32 %v701_v44, %v700_v42  ;;  %v484_v47 = vadd.f32 %v699_v41, %v237_v38  ;;  %v534_v48 = vpop.f32.mrb[1].mxu1 }
 0x10b   : > { %v535_v49 = vpop.f32.mrb[2].mxu1 }
 0x10c   : > { %v533_v50 = vadd.f32 %v532_v45, %v484_v47  ;;  %v487_v51 = vadd.f32 %v702_v46, %v242_v43  ;;  %v537_v52 = vpop.f32.mrb[3].mxu1 }
 0x10e   : > { %v547_v54 = vmax.f32 %v533_v50, 0.0  ;;  %v536_v55 = vadd.f32 %v535_v49, %v487_v51  ;;  %v703_v56 = vpop.f32.mrb[4].mxu0 }
 0x10f   : > { %v704_v57 = vpop.f32.mrb[5].mxu0 }
 0x110   : > { %v677_v58 = vpack.c.bf16 %v547_v54, %v547_v54  ;;  %v548_v59 = vmax.f32 %v536_v55, 0.0  ;;  %v705_v60 = vadd.f32 %v704_v57, %v703_v56  ;;  %v706_v61 = vpop.f32.mrb[6].mxu0 }
 0x111   : > { %v707_v62 = vpop.f32.mrb[7].mxu0  ;;  %v540_v63 = vpop.f32.mrb[4].mxu1 }
 0x112   : > { %568 = vst.msk [vmem:[%s170_s20] sm:$0xf] %vm567_vm1, %v677_v58  ;;  %v678_v0 = vpack.c.bf16 %v548_v59, %v548_v59  ;;  %v708_v1 = vadd.f32 %v707_v62, %v706_v61  ;;  %v492_v2 = vadd.f32 %v705_v60, %v247_v53  ;;  %v542_v3 = vpop.f32.mrb[5].mxu1 }
 0x113   : > { %v543_v5 = vpop.f32.mrb[6].mxu1 }
 0x114   : > { %569 = vst.msk [vmem:[%s170_s20 + $0x4] sm:$0xf] %vm567_vm1, %v678_v0  ;;  %v541_v6 = vadd.f32 %v540_v63, %v492_v2  ;;  %v495_v7 = vadd.f32 %v708_v1, %v252_v4  ;;  %v545_v8 = vpop.f32.mrb[7].mxu1 }
 0x116   : > { %v549_v9 = vmax.f32 %v541_v6, 0.0  ;;  %v544_v10 = vadd.f32 %v543_v5, %v495_v7 }
 0x118   : > { %v679_v11 = vpack.c.bf16 %v549_v9, %v549_v9  ;;  %v550_v12 = vmax.f32 %v544_v10, 0.0 }
 0x11a   : > { %570 = vst.msk [vmem:[%s170_s20 + $0x8] sm:$0xf] %vm567_vm1, %v679_v11  ;;  %v680_v13 = vpack.c.bf16 %v550_v12, %v550_v12 }
 0x11c   : > { %571 = vst.msk [vmem:[%s170_s20 + $0xc] sm:$0xf] %vm567_vm1, %v680_v13 }
 0x11d PF: > { %s13_s12 = sadd.s32 1, %s764_s12  }
 0x11e   : > { %p10_p4 = scmp.ge.s32.totalorder %s13_s12, 4  }
 0x120   :  { %12 = sbr.rel (!%p10_p4) target bundleno = 1 (0x1), region = 62 }

// kernel: policy_forward.5
= control target key start
LH: loop header
LB: loop body
LE: loop exit
PB: predicated region body
PF: predicated region fallthrough
CT: control target
= control target key end

     0   :  { %v283_v36 = vlaneseq  ;;  %v2938_v37 = vmov 1966171168   ;;  %vm2202_vm0 = vcmask 1024   ;;  %s3854_s1 = inlined_call_operand.vmem [shape: bf16[2048,256], index: 1, kind: input, shape index: {}]   ;;  %s3855_s0 = inlined_call_operand.vmem [shape: bf16[2,2048], index: 0, kind: input, shape index: {}]   ;;  %s3856_s3 = inlined_call_operand.vmem [shape: bf16[256,1], index: 3, kind: input, shape index: {}]   ;;  %s3857_s2 = inlined_call_operand.vmem [shape: f32[1,256], index: 2, kind: input, shape index: {}]   ;;  %s3858_s4 = inlined_call_operand.<no memory space> [shape: f32[1,1], index: 4, kind: input, shape index: {}]   ;;  %s3859_s5 = inlined_call_operand.vmem [shape: f32[2,1], index: 5, kind: output, shape index: {}]  }
   0x1   :  { %v2532_v0 = vld [vmem:[%s3854_s1 + $0x4] ss:$8 sps:$4 sm:$0xff]   ;;  %v2536_v2 = vld [vmem:[%s3854_s1] ss:$8 sps:$4 sm:$0xff]   ;;  %v2538_v4 = vld [vmem:[%s3854_s1 + $0x14] ss:$8 sps:$4 sm:$0xff]   ;;  %v297_v38 = vunpack.c.l.s4 %v2938_v37 }
   0x2   :  { %v2534_v1 = vld [vmem:[%s3854_s1 + $0x404] ss:$8 sps:$4 sm:$0xff]   ;;  %1689 = vmatprep.subr.bf16.mxu1 %v2532_v0  ;;  %v2537_v3 = vld [vmem:[%s3854_s1 + $0x400] ss:$8 sps:$4 sm:$0xff]   ;;  %v2540_v5 = vld [vmem:[%s3854_s1 + $0x414] ss:$8 sps:$4 sm:$0xff]  }
   0x3   :  { %1853 = vmatprep.subr.bf16.mxu0 %v2534_v1  ;;  %1690 = vmatpush1.bf16.msra.mxu1 %v2536_v2  ;;  %v2542_v6 = vld [vmem:[%s3854_s1 + $0x10] ss:$8 sps:$4 sm:$0xff]   ;;  %v2544_v8 = vld [vmem:[%s3854_s1 + $0x24] ss:$8 sps:$4 sm:$0xff]   ;;  %v2548_v10 = vld [vmem:[%s3854_s1 + $0x20] ss:$8 sps:$4 sm:$0xff]   ;;  %v298_v43 = vunpack.c.0.s8 %v297_v38 }
   0x4   :  { %1854 = vmatpush1.bf16.msra.mxu0 %v2537_v3  ;;  %1691 = vmatprep.subr.bf16.mxu1 %v2538_v4  ;;  %v2543_v7 = vld [vmem:[%s3854_s1 + $0x410] ss:$8 sps:$4 sm:$0xff]   ;;  %v2546_v9 = vld [vmem:[%s3854_s1 + $0x424] ss:$8 sps:$4 sm:$0xff]   ;;  %v2549_v11 = vld [vmem:[%s3854_s1 + $0x420] ss:$8 sps:$4 sm:$0xff]  }
   0x5   :  { %1855 = vmatprep.subr.bf16.mxu0 %v2540_v5  ;;  %v2550_v12 = vld [vmem:[%s3854_s1 + $0x34] ss:$8 sps:$4 sm:$0xff]   ;;  %v2554_v14 = vld [vmem:[%s3854_s1 + $0x30] ss:$8 sps:$4 sm:$0xff]   ;;  %v2556_v16 = vld [vmem:[%s3854_s1 + $0x44] ss:$8 sps:$4 sm:$0xff]  }
   0x6   :  { %v2552_v13 = vld [vmem:[%s3854_s1 + $0x434] ss:$8 sps:$4 sm:$0xff]   ;;  %v2555_v15 = vld [vmem:[%s3854_s1 + $0x430] ss:$8 sps:$4 sm:$0xff]   ;;  %v2558_v17 = vld [vmem:[%s3854_s1 + $0x444] ss:$8 sps:$4 sm:$0xff]  }
   0x7   :  { %1692 = vmatpush1.bf16.msra.mxu1 %v2542_v6  ;;  %v2560_v18 = vld [vmem:[%s3854_s1 + $0x40] ss:$8 sps:$4 sm:$0xff]   ;;  %v2562_v20 = vld [vmem:[%s3854_s1 + $0x54] ss:$8 sps:$4 sm:$0xff]   ;;  %v2566_v22 = vld [vmem:[%s3854_s1 + $0x50] ss:$8 sps:$4 sm:$0xff]  }
   0x8   :  { %1856 = vmatpush1.bf16.msra.mxu0 %v2543_v7  ;;  %1693 = vmatprep.subr.bf16.mxu1 %v2544_v8  ;;  %v2561_v19 = vld [vmem:[%s3854_s1 + $0x440] ss:$8 sps:$4 sm:$0xff]   ;;  %v2564_v21 = vld [vmem:[%s3854_s1 + $0x454] ss:$8 sps:$4 sm:$0xff]   ;;  %v2567_v23 = vld [vmem:[%s3854_s1 + $0x450] ss:$8 sps:$4 sm:$0xff]  }
   0x9   :  { %1857 = vmatprep.subr.bf16.mxu0 %v2546_v9  ;;  %v2568_v24 = vld [vmem:[%s3854_s1 + $0x64] ss:$8 sps:$4 sm:$0xff]   ;;  %v2572_v26 = vld [vmem:[%s3854_s1 + $0x60] ss:$8 sps:$4 sm:$0xff]   ;;  %v2574_v28 = vld [vmem:[%s3854_s1 + $0x74] ss:$8 sps:$4 sm:$0xff]  }
   0xa   :  { %v2570_v25 = vld [vmem:[%s3854_s1 + $0x464] ss:$8 sps:$4 sm:$0xff]   ;;  %v2573_v27 = vld [vmem:[%s3854_s1 + $0x460] ss:$8 sps:$4 sm:$0xff]   ;;  %v2576_v29 = vld [vmem:[%s3854_s1 + $0x474] ss:$8 sps:$4 sm:$0xff]  }
   0xb   :  { %1694 = vmatpush1.bf16.msra.mxu1 %v2548_v10  ;;  %v2578_v30 = vld [vmem:[%s3854_s1 + $0x70] ss:$8 sps:$4 sm:$0xff]   ;;  %v2580_v32 = vld [vmem:[%s3854_s1 + $0x84] ss:$8 sps:$4 sm:$0xff]   ;;  %v2584_v34 = vld [vmem:[%s3854_s1 + $0x80] ss:$8 sps:$4 sm:$0xff]  }
   0xc   :  { %1858 = vmatpush1.bf16.msra.mxu0 %v2549_v11  ;;  %1695 = vmatprep.subr.bf16.mxu1 %v2550_v12  ;;  %v2579_v31 = vld [vmem:[%s3854_s1 + $0x470] ss:$8 sps:$4 sm:$0xff]   ;;  %v2582_v33 = vld [vmem:[%s3854_s1 + $0x484] ss:$8 sps:$4 sm:$0xff]   ;;  %v2585_v35 = vld [vmem:[%s3854_s1 + $0x480] ss:$8 sps:$4 sm:$0xff]  }
   0xd   :  { %1859 = vmatprep.subr.bf16.mxu0 %v2552_v13  ;;  %v2586_v39 = vld [vmem:[%s3854_s1 + $0x94] ss:$8 sps:$4 sm:$0xff]   ;;  %v2590_v41 = vld [vmem:[%s3854_s1 + $0x90] ss:$8 sps:$4 sm:$0xff]   ;;  %v3086_v42 = vshrl.u32 %v283_v36, 7  ;;  %v23_v52 = vld [vmem:[%s3855_s0] sm:$0xff] }
   0xe   :  { %v2588_v40 = vld [vmem:[%s3854_s1 + $0x494] ss:$8 sps:$4 sm:$0xff]   ;;  %v2591_v44 = vld [vmem:[%s3854_s1 + $0x490] ss:$8 sps:$4 sm:$0xff]   ;;  %v2592_v45 = vld [vmem:[%s3854_s1 + $0xa4] ss:$8 sps:$4 sm:$0xff]   ;;  %v295_v12 = vcombine.high %v23_v52, %v23_v52 }
   0xf   :  { %1696 = vmatpush1.bf16.msra.mxu1 %v2554_v14  ;;  %v2594_v46 = vld [vmem:[%s3854_s1 + $0x4a4] ss:$8 sps:$4 sm:$0xff]   ;;  %v2596_v47 = vld [vmem:[%s3854_s1 + $0xa0] ss:$8 sps:$4 sm:$0xff]   ;;  %v3104_v49 = vsub.s32 %v298_v43, %v3086_v42  ;;  %v2598_v50 = vld [vmem:[%s3854_s1 + $0xb4] ss:$8 sps:$4 sm:$0xff]  }
  0x10   :  { %1860 = vmatpush1.bf16.msra.mxu0 %v2555_v15  ;;  %1697 = vmatprep.subr.bf16.mxu1 %v2556_v16  ;;  %v2597_v48 = vld [vmem:[%s3854_s1 + $0x4a0] ss:$8 sps:$4 sm:$0xff]   ;;  %v2600_v51 = vld [vmem:[%s3854_s1 + $0x4b4] ss:$8 sps:$4 sm:$0xff]   ;;  %v2602_v53 = vld [vmem:[%s3854_s1 + $0xb0] ss:$8 sps:$4 sm:$0xff]  }
  0x11   :  { %1861 = vmatprep.subr.bf16.mxu0 %v2558_v17  ;;  %v302_v54 = vrot.slane %v23_v52, %v3104_v49  ;;  %v2603_v55 = vld [vmem:[%s3854_s1 + $0x4b0] ss:$8 sps:$4 sm:$0xff]   ;;  %v24_v56 = vld [vmem:[%s3855_s0 + $0x8] sm:$0xff]  ;;  %v2610_v1 = vld [vmem:[%s3854_s1 + $0xd4] ss:$8 sps:$4 sm:$0xff]  }
  0x12   :  { %v2604_v57 = vld [vmem:[%s3854_s1 + $0xc4] ss:$8 sps:$4 sm:$0xff]   ;;  %v351_v60 = vrot.slane %v24_v56, %v3104_v49  ;;  %v2608_v63 = vld [vmem:[%s3854_s1 + $0xc0] ss:$8 sps:$4 sm:$0xff]   ;;  %v2612_v2 = vld [vmem:[%s3854_s1 + $0x4d4] ss:$8 sps:$4 sm:$0xff]   ;;  %v344_v13 = vcombine.high %v24_v56, %v24_v56 }
  0x13   :  { %1698 = vmatpush1.bf16.msra.mxu1 %v2560_v18  ;;  %v2606_v58 = vld [vmem:[%s3854_s1 + $0x4c4] ss:$8 sps:$4 sm:$0xff]   ;;  %v310_v59 = vcombine.high %v302_v54, %v302_v54  ;;  %v2609_v0 = vld [vmem:[%s3854_s1 + $0x4c0] ss:$8 sps:$4 sm:$0xff]   ;;  %v2614_v4 = vld [vmem:[%s3854_s1 + $0xd0] ss:$8 sps:$4 sm:$0xff]   ;;  %v309_v18 = vrot.slane %v295_v12, %v3104_v49 }
  0x14   :  { %1862 = vmatpush1.bf16.msra.mxu0 %v2561_v19  ;;  %1699 = vmatprep.subr.bf16.mxu1 %v2562_v20  ;;  %v359_v62 = vcombine.high %v351_v60, %v351_v60  ;;  %v2615_v5 = vld [vmem:[%s3854_s1 + $0x4d0] ss:$8 sps:$4 sm:$0xff]   ;;  %v2616_v6 = vld [vmem:[%s3854_s1 + $0xe4] ss:$8 sps:$4 sm:$0xff]   ;;  %v2620_v8 = vld [vmem:[%s3854_s1 + $0xe0] ss:$8 sps:$4 sm:$0xff]   ;;  %v358_v19 = vrot.slane %v344_v13, %v3104_v49  ;;  %v3188_v20 = vrot.slane %v302_v54, %v3104_v49 }
  0x15   :  { %1863 = vmatprep.subr.bf16.mxu0 %v2564_v21  ;;  %v3133_v61 = vrot.slane %v310_v59, %v3104_v49  ;;  %v2618_v7 = vld [vmem:[%s3854_s1 + $0x4e4] ss:$8 sps:$4 sm:$0xff]   ;;  %v2621_v9 = vld [vmem:[%s3854_s1 + $0x4e0] ss:$8 sps:$4 sm:$0xff]   ;;  %v2622_v10 = vld [vmem:[%s3854_s1 + $0xf4] ss:$8 sps:$4 sm:$0xff]   ;;  %v3191_v21 = vrot.slane %v351_v60, %v3104_v49 }
  0x16   :  { %v381_v3 = vrot.slane %v359_v62, %v3104_v49  ;;  %v2624_v11 = vld [vmem:[%s3854_s1 + $0x4f4] ss:$8 sps:$4 sm:$0xff]   ;;  %v2626_v14 = vld [vmem:[%s3854_s1 + $0xf0] ss:$8 sps:$4 sm:$0xff]   ;;  %v2631_v16 = vld [vmem:[%s3854_s1 + $0x104] ss:$8 sps:$4 sm:$0xff]  }
  0x17   :  { %1700 = vmatpush1.bf16.msra.mxu1 %v2566_v22  ;;  %1721 = vmatprep.mubr.bf16.mxu1 %v3133_v61  ;;  %v2627_v15 = vld [vmem:[%s3854_s1 + $0x4f0] ss:$8 sps:$4 sm:$0xff]   ;;  %v2635_v17 = vld [vmem:[%s3854_s1 + $0x504] ss:$8 sps:$4 sm:$0xff]   ;;  %v311_v22 = vcombine.high %v309_v18, %v309_v18  ;;  %v2642_v38 = vld [vmem:[%s3854_s1 + $0x120] ss:$8 sps:$4 sm:$0xff]  }
  0x18   :  { %1864 = vmatpush1.bf16.msra.mxu0 %v2567_v23  ;;  %1701 = vmatprep.subr.bf16.mxu1 %v2568_v24  ;;  %v360_v23 = vcombine.high %v358_v19, %v358_v19  ;;  %v2629_v24 = vld [vmem:[%s3854_s1 + $0x100] ss:$8 sps:$4 sm:$0xff]   ;;  %v2644_v36 = vld [vmem:[%s3854_s1 + $0x124] ss:$8 sps:$4 sm:$0xff]   ;;  %v2648_v43 = vld [vmem:[%s3854_s1 + $0x130] ss:$8 sps:$4 sm:$0xff]  }
  0x19   :  { %1865 = vmatprep.subr.bf16.mxu0 %v2570_v25  ;;  %1885 = vmatprep.mubr.bf16.mxu0 %v381_v3  ;;  %v2633_v25 = vld [vmem:[%s3854_s1 + $0x500] ss:$8 sps:$4 sm:$0xff]   ;;  %v2647_v37 = vld [vmem:[%s3854_s1 + $0x524] ss:$8 sps:$4 sm:$0xff]   ;;  %v2663_v52 = vld [vmem:[%s3854_s1 + $0x550] ss:$8 sps:$4 sm:$0xff]  }
  0x1a   :  { %v2671_v54 = vld [vmem:[%s3854_s1 + $0x564] ss:$8 sps:$4 sm:$0xff]   ;;  %v2669_v56 = vld [vmem:[%s3854_s1 + $0x560] ss:$8 sps:$4 sm:$0xff]   ;;  %v2672_v59 = vld [vmem:[%s3854_s1 + $0x170] ss:$8 sps:$4 sm:$0xff]  }
  0x1b   :  { %1702 = vmatpush1.bf16.msra.mxu1 %v2572_v26  ;;  %v2638_v26 = vld [vmem:[%s3854_s1 + $0x114] ss:$8 sps:$4 sm:$0xff]   ;;  %v2675_v60 = vld [vmem:[%s3854_s1 + $0x570] ss:$8 sps:$4 sm:$0xff]   ;;  %v2683_v62 = vld [vmem:[%s3854_s1 + $0x584] ss:$8 sps:$4 sm:$0xff]  }
  0x1c   :  { %1866 = vmatpush1.bf16.msra.mxu0 %v2573_v27  ;;  %1703 = vmatprep.subr.bf16.mxu1 %v2574_v28  ;;  %v2641_v27 = vld [vmem:[%s3854_s1 + $0x514] ss:$8 sps:$4 sm:$0xff]   ;;  %v3206_v28 = vrot.slane %v311_v22, %v3104_v49  ;;  %v2699_v12 = vld [vmem:[%s3854_s1 + $0x5b0] ss:$8 sps:$4 sm:$0xff]   ;;  %v2704_v13 = vld [vmem:[%s3854_s1 + $0x1c4] ss:$8 sps:$4 sm:$0xff]  }
  0x1d   :  { %1867 = vmatprep.subr.bf16.mxu0 %v2576_v29  ;;  %v3209_v29 = vrot.slane %v360_v23, %v3104_v49  ;;  %v2711_v22 = vld [vmem:[%s3854_s1 + $0x5d0] ss:$8 sps:$4 sm:$0xff]   ;;  %v2716_v23 = vld [vmem:[%s3854_s1 + $0x1e4] ss:$8 sps:$4 sm:$0xff]  }
  0x1f   :  { %1704 = vmatpush1.bf16.msra.mxu1 %v2578_v30  ;;  %v3212_v30 = vrot.slane %v309_v18, %v3104_v49  ;;  %v2713_v18 = vld [vmem:[%s3854_s1 + $0x5d4] ss:$8 sps:$4 sm:$0xff]  }
  0x20   :  { %1868 = vmatpush1.bf16.msra.mxu0 %v2579_v31  ;;  %1705 = vmatprep.subr.bf16.mxu1 %v2580_v32  ;;  %v342_v31 = vcombine.high %v3133_v61, %v3133_v61  ;;  %v391_v32 = vcombine.high %v381_v3, %v381_v3  ;;  %v2680_v61 = vld [vmem:[%s3854_s1 + $0x184] ss:$8 sps:$4 sm:$0xff]   ;;  %v2684_v3 = vld [vmem:[%s3854_s1 + $0x190] ss:$8 sps:$4 sm:$0xff]  }
  0x21   :  { %1869 = vmatprep.subr.bf16.mxu0 %v2582_v33  ;;  %v3217_v33 = vrot.slane %v358_v19, %v3104_v49  ;;  %v2662_v49 = vld [vmem:[%s3854_s1 + $0x154] ss:$8 sps:$4 sm:$0xff]   ;;  %v2708_v19 = vld [vmem:[%s3854_s1 + $0x1d0] ss:$8 sps:$4 sm:$0xff]  }
  0x23   :  { %1706 = vmatpush1.bf16.msra.mxu1 %v2584_v34  ;;  %v2636_v34 = vld [vmem:[%s3854_s1 + $0x110] ss:$8 sps:$4 sm:$0xff]  }
  0x24   :  { %1870 = vmatpush1.bf16.msra.mxu0 %v2585_v35  ;;  %1707 = vmatprep.subr.bf16.mxu1 %v2586_v39  ;;  %v2639_v35 = vld [vmem:[%s3854_s1 + $0x510] ss:$8 sps:$4 sm:$0xff]   ;;  %v2645_v39 = vld [vmem:[%s3854_s1 + $0x520] ss:$8 sps:$4 sm:$0xff]  }
  0x25   :  { %1871 = vmatprep.subr.bf16.mxu0 %v2588_v40  ;;  %v2650_v40 = vld [vmem:[%s3854_s1 + $0x134] ss:$8 sps:$4 sm:$0xff]  }
  0x27   :  { %1708 = vmatpush1.bf16.msra.mxu1 %v2590_v41  ;;  %v2653_v41 = vld [vmem:[%s3854_s1 + $0x534] ss:$8 sps:$4 sm:$0xff]  }
  0x28   :  { %1872 = vmatpush1.bf16.msra.mxu0 %v2591_v44  ;;  %1709 = vmatprep.subr.bf16.mxu1 %v2592_v45  ;;  %v2651_v44 = vld [vmem:[%s3854_s1 + $0x530] ss:$8 sps:$4 sm:$0xff]   ;;  %v2656_v45 = vld [vmem:[%s3854_s1 + $0x144] ss:$8 sps:$4 sm:$0xff]  }
  0x29   :  { %1873 = vmatprep.subr.bf16.mxu0 %v2594_v46  ;;  %v2659_v46 = vld [vmem:[%s3854_s1 + $0x544] ss:$8 sps:$4 sm:$0xff]  }
  0x2b   :  { %1710 = vmatpush1.bf16.msra.mxu1 %v2596_v47  ;;  %v2654_v47 = vld [vmem:[%s3854_s1 + $0x140] ss:$8 sps:$4 sm:$0xff]  }
  0x2c   :  { %1874 = vmatpush1.bf16.msra.mxu0 %v2597_v48  ;;  %1711 = vmatprep.subr.bf16.mxu1 %v2598_v50  ;;  %v2657_v48 = vld [vmem:[%s3854_s1 + $0x540] ss:$8 sps:$4 sm:$0xff]   ;;  %v2665_v50 = vld [vmem:[%s3854_s1 + $0x554] ss:$8 sps:$4 sm:$0xff]  }
  0x2d   :  { %1875 = vmatprep.subr.bf16.mxu0 %v2600_v51  ;;  %v2660_v51 = vld [vmem:[%s3854_s1 + $0x150] ss:$8 sps:$4 sm:$0xff]  }
  0x2f   :  { %1712 = vmatpush1.bf16.msra.mxu1 %v2602_v53  ;;  %v2668_v53 = vld [vmem:[%s3854_s1 + $0x164] ss:$8 sps:$4 sm:$0xff]  }
  0x30   :  { %1876 = vmatpush1.bf16.msra.mxu0 %v2603_v55  ;;  %1713 = vmatprep.subr.bf16.mxu1 %v2604_v57  ;;  %v2666_v55 = vld [vmem:[%s3854_s1 + $0x160] ss:$8 sps:$4 sm:$0xff]   ;;  %v2674_v57 = vld [vmem:[%s3854_s1 + $0x174] ss:$8 sps:$4 sm:$0xff]  }
  0x31   :  { %1877 = vmatprep.subr.bf16.mxu0 %v2606_v58  ;;  %v2677_v58 = vld [vmem:[%s3854_s1 + $0x574] ss:$8 sps:$4 sm:$0xff]  }
  0x33   :  { %1714 = vmatpush1.bf16.msra.mxu1 %v2608_v63  ;;  %v2678_v63 = vld [vmem:[%s3854_s1 + $0x180] ss:$8 sps:$4 sm:$0xff]  }
  0x34   :  { %1878 = vmatpush1.bf16.msra.mxu0 %v2609_v0  ;;  %1715 = vmatprep.subr.bf16.mxu1 %v2610_v1  ;;  %v2681_v0 = vld [vmem:[%s3854_s1 + $0x580] ss:$8 sps:$4 sm:$0xff]   ;;  %v2686_v1 = vld [vmem:[%s3854_s1 + $0x194] ss:$8 sps:$4 sm:$0xff]  }
  0x35   :  { %1879 = vmatprep.subr.bf16.mxu0 %v2612_v2  ;;  %v2689_v2 = vld [vmem:[%s3854_s1 + $0x594] ss:$8 sps:$4 sm:$0xff]  }
  0x37   :  { %1716 = vmatpush1.bf16.msra.mxu1 %v2614_v4  ;;  %v2687_v4 = vld [vmem:[%s3854_s1 + $0x590] ss:$8 sps:$4 sm:$0xff]  }
  0x38   :  { %1880 = vmatpush1.bf16.msra.mxu0 %v2615_v5  ;;  %1717 = vmatprep.subr.bf16.mxu1 %v2616_v6  ;;  %v2692_v5 = vld [vmem:[%s3854_s1 + $0x1a4] ss:$8 sps:$4 sm:$0xff]  }
  0x39   :  { %1881 = vmatprep.subr.bf16.mxu0 %v2618_v7  ;;  %v2695_v6 = vld [vmem:[%s3854_s1 + $0x5a4] ss:$8 sps:$4 sm:$0xff]   ;;  %v2690_v7 = vld [vmem:[%s3854_s1 + $0x1a0] ss:$8 sps:$4 sm:$0xff]  }
  0x3b   :  { %1718 = vmatpush1.bf16.msra.mxu1 %v2620_v8  ;;  %v2693_v8 = vld [vmem:[%s3854_s1 + $0x5a0] ss:$8 sps:$4 sm:$0xff]  }
  0x3c   :  { %1882 = vmatpush1.bf16.msra.mxu0 %v2621_v9  ;;  %1719 = vmatprep.subr.bf16.mxu1 %v2622_v10  ;;  %v2698_v9 = vld [vmem:[%s3854_s1 + $0x1b4] ss:$8 sps:$4 sm:$0xff]  }
  0x3d   :  { %1883 = vmatprep.subr.bf16.mxu0 %v2624_v11  ;;  %v2701_v10 = vld [vmem:[%s3854_s1 + $0x5b4] ss:$8 sps:$4 sm:$0xff]   ;;  %v2696_v11 = vld [vmem:[%s3854_s1 + $0x1b0] ss:$8 sps:$4 sm:$0xff]  }
  0x3f   :  { %1720 = vmatpush1.bf16.msra.mxu1 %v2626_v14  ;;  %v2707_v14 = vld [vmem:[%s3854_s1 + $0x5c4] ss:$8 sps:$4 sm:$0xff]  }
  0x40   :  { %1884 = vmatpush1.bf16.msra.mxu0 %v2627_v15  ;;  %1730 = vmatprep.subr.bf16.mxu1 %v2631_v16  ;;  %v2702_v15 = vld [vmem:[%s3854_s1 + $0x1c0] ss:$8 sps:$4 sm:$0xff]  }
  0x41   :  { %1894 = vmatprep.subr.bf16.mxu0 %v2635_v17  ;;  %v2705_v16 = vld [vmem:[%s3854_s1 + $0x5c0] ss:$8 sps:$4 sm:$0xff]   ;;  %v2710_v17 = vld [vmem:[%s3854_s1 + $0x1d4] ss:$8 sps:$4 sm:$0xff]  }
  0x42   :  { %1722 = vmatmul.mubr.bf16.vlgmr.msra.gmra.mrb[0].mxu1 %v3188_v20 }
  0x43   :  { %1886 = vmatmul.mubr.bf16.vlgmr.msra.gmra.mrb[0].mxu0 %v3191_v21  ;;  %1731 = vmatpush1.bf16.msra.mxu1 %v2629_v24  ;;  %v2719_v24 = vld [vmem:[%s3854_s1 + $0x5e4] ss:$8 sps:$4 sm:$0xff]  }
  0x44   :  { %1895 = vmatpush1.bf16.msra.mxu0 %v2633_v25  ;;  %1732 = vmatprep.subr.bf16.mxu1 %v2638_v26  ;;  %v2714_v25 = vld [vmem:[%s3854_s1 + $0x1e0] ss:$8 sps:$4 sm:$0xff]  }
  0x45   :  { %1896 = vmatprep.subr.bf16.mxu0 %v2641_v27  ;;  %1762 = vmatprep.mubr.bf16.mxu1 %v342_v31  ;;  %v2717_v26 = vld [vmem:[%s3854_s1 + $0x5e0] ss:$8 sps:$4 sm:$0xff]   ;;  %v2722_v27 = vld [vmem:[%s3854_s1 + $0x1f4] ss:$8 sps:$4 sm:$0xff]  }
  0x46   :  { %1926 = vmatprep.mubr.bf16.mxu0 %v391_v32  ;;  %v2725_v31 = vld [vmem:[%s3854_s1 + $0x5f4] ss:$8 sps:$4 sm:$0xff]   ;;  %v2720_v32 = vld [vmem:[%s3854_s1 + $0x1f0] ss:$8 sps:$4 sm:$0xff]  }
  0x47   :  { %1733 = vmatpush1.bf16.msra.mxu1 %v2636_v34  ;;  %v2723_v34 = vld [vmem:[%s3854_s1 + $0x5f0] ss:$8 sps:$4 sm:$0xff]  }
  0x48   :  { %1897 = vmatpush1.bf16.msra.mxu0 %v2639_v35  ;;  %1734 = vmatprep.subr.bf16.mxu1 %v2644_v36  ;;  %v2728_v35 = vld [vmem:[%s3854_s1 + $0x204] ss:$8 sps:$4 sm:$0xff]  }
  0x49   :  { %1898 = vmatprep.subr.bf16.mxu0 %v2647_v37  ;;  %v2731_v36 = vld [vmem:[%s3854_s1 + $0x604] ss:$8 sps:$4 sm:$0xff]   ;;  %v340_v37 = vcombine.high %v3188_v20, %v3188_v20  ;;  %v2737_v20 = vld [vmem:[%s3854_s1 + $0x614] ss:$8 sps:$4 sm:$0xff]  }
  0x4b   :  { %1735 = vmatpush1.bf16.msra.mxu1 %v2642_v38  ;;  %v389_v38 = vcombine.high %v3191_v21, %v3191_v21  ;;  %v2732_v21 = vld [vmem:[%s3854_s1 + $0x210] ss:$8 sps:$4 sm:$0xff]  }
  0x4c   :  { %1899 = vmatpush1.bf16.msra.mxu0 %v2645_v39  ;;  %1736 = vmatprep.subr.bf16.mxu1 %v2650_v40  ;;  %v2726_v39 = vld [vmem:[%s3854_s1 + $0x200] ss:$8 sps:$4 sm:$0xff]  }
  0x4d   :  { %1900 = vmatprep.subr.bf16.mxu0 %v2653_v41  ;;  %v2729_v40 = vld [vmem:[%s3854_s1 + $0x600] ss:$8 sps:$4 sm:$0xff]   ;;  %v2734_v41 = vld [vmem:[%s3854_s1 + $0x214] ss:$8 sps:$4 sm:$0xff]  }
  0x4f   :  { %1737 = vmatpush1.bf16.msra.mxu1 %v2648_v43  ;;  %v2735_v43 = vld [vmem:[%s3854_s1 + $0x610] ss:$8 sps:$4 sm:$0xff]  }
  0x50   :  { %1901 = vmatpush1.bf16.msra.mxu0 %v2651_v44  ;;  %1738 = vmatprep.subr.bf16.mxu1 %v2656_v45  ;;  %v2740_v44 = vld [vmem:[%s3854_s1 + $0x224] ss:$8 sps:$4 sm:$0xff]  }
  0x51   :  { %1902 = vmatprep.subr.bf16.mxu0 %v2659_v46  ;;  %v2743_v45 = vld [vmem:[%s3854_s1 + $0x624] ss:$8 sps:$4 sm:$0xff]   ;;  %v2738_v46 = vld [vmem:[%s3854_s1 + $0x220] ss:$8 sps:$4 sm:$0xff]  }
  0x53   :  { %1739 = vmatpush1.bf16.msra.mxu1 %v2654_v47  ;;  %v2741_v47 = vld [vmem:[%s3854_s1 + $0x620] ss:$8 sps:$4 sm:$0xff]  }
  0x54   :  { %1903 = vmatpush1.bf16.msra.mxu0 %v2657_v48  ;;  %1740 = vmatprep.subr.bf16.mxu1 %v2662_v49  ;;  %v2746_v48 = vld [vmem:[%s3854_s1 + $0x234] ss:$8 sps:$4 sm:$0xff]  }
  0x55   :  { %1904 = vmatprep.subr.bf16.mxu0 %v2665_v50  ;;  %v2749_v49 = vld [vmem:[%s3854_s1 + $0x634] ss:$8 sps:$4 sm:$0xff]   ;;  %v2744_v50 = vld [vmem:[%s3854_s1 + $0x230] ss:$8 sps:$4 sm:$0xff]  }
  0x57   :  { %1741 = vmatpush1.bf16.msra.mxu1 %v2660_v51  ;;  %v2747_v51 = vld [vmem:[%s3854_s1 + $0x630] ss:$8 sps:$4 sm:$0xff]  }
  0x58   :  { %1905 = vmatpush1.bf16.msra.mxu0 %v2663_v52  ;;  %1742 = vmatprep.subr.bf16.mxu1 %v2668_v53  ;;  %v2752_v52 = vld [vmem:[%s3854_s1 + $0x244] ss:$8 sps:$4 sm:$0xff]  }
  0x59   :  { %1906 = vmatprep.subr.bf16.mxu0 %v2671_v54  ;;  %v2755_v53 = vld [vmem:[%s3854_s1 + $0x644] ss:$8 sps:$4 sm:$0xff]   ;;  %v2750_v54 = vld [vmem:[%s3854_s1 + $0x240] ss:$8 sps:$4 sm:$0xff]  }
  0x5b   :  { %1743 = vmatpush1.bf16.msra.mxu1 %v2666_v55  ;;  %v2753_v55 = vld [vmem:[%s3854_s1 + $0x640] ss:$8 sps:$4 sm:$0xff]  }
  0x5c   :  { %1907 = vmatpush1.bf16.msra.mxu0 %v2669_v56  ;;  %1744 = vmatprep.subr.bf16.mxu1 %v2674_v57  ;;  %v2758_v56 = vld [vmem:[%s3854_s1 + $0x254] ss:$8 sps:$4 sm:$0xff]  }
  0x5d   :  { %1908 = vmatprep.subr.bf16.mxu0 %v2677_v58  ;;  %v2761_v57 = vld [vmem:[%s3854_s1 + $0x654] ss:$8 sps:$4 sm:$0xff]   ;;  %v2756_v58 = vld [vmem:[%s3854_s1 + $0x250] ss:$8 sps:$4 sm:$0xff]  }
  0x5f   :  { %1745 = vmatpush1.bf16.msra.mxu1 %v2672_v59  ;;  %v2759_v59 = vld [vmem:[%s3854_s1 + $0x650] ss:$8 sps:$4 sm:$0xff]  }
  0x60   :  { %1909 = vmatpush1.bf16.msra.mxu0 %v2675_v60  ;;  %1746 = vmatprep.subr.bf16.mxu1 %v2680_v61  ;;  %v2764_v60 = vld [vmem:[%s3854_s1 + $0x264] ss:$8 sps:$4 sm:$0xff]  }
  0x61   :  { %1910 = vmatprep.subr.bf16.mxu0 %v2683_v62  ;;  %v2767_v61 = vld [vmem:[%s3854_s1 + $0x664] ss:$8 sps:$4 sm:$0xff]   ;;  %v2762_v62 = vld [vmem:[%s3854_s1 + $0x260] ss:$8 sps:$4 sm:$0xff]  }
  0x63   :  { %1747 = vmatpush1.bf16.msra.mxu1 %v2678_v63  ;;  %v2765_v63 = vld [vmem:[%s3854_s1 + $0x660] ss:$8 sps:$4 sm:$0xff]  }
  0x64   :  { %1911 = vmatpush1.bf16.msra.mxu0 %v2681_v0  ;;  %1748 = vmatprep.subr.bf16.mxu1 %v2686_v1  ;;  %v2770_v0 = vld [vmem:[%s3854_s1 + $0x274] ss:$8 sps:$4 sm:$0xff]  }
  0x65   :  { %1912 = vmatprep.subr.bf16.mxu0 %v2689_v2  ;;  %v2773_v1 = vld [vmem:[%s3854_s1 + $0x674] ss:$8 sps:$4 sm:$0xff]   ;;  %v2768_v2 = vld [vmem:[%s3854_s1 + $0x270] ss:$8 sps:$4 sm:$0xff]  }
  0x67   :  { %1749 = vmatpush1.bf16.msra.mxu1 %v2684_v3  ;;  %v2771_v3 = vld [vmem:[%s3854_s1 + $0x670] ss:$8 sps:$4 sm:$0xff]  }
  0x68   :  { %1913 = vmatpush1.bf16.msra.mxu0 %v2687_v4  ;;  %1750 = vmatprep.subr.bf16.mxu1 %v2692_v5  ;;  %v2776_v4 = vld [vmem:[%s3854_s1 + $0x284] ss:$8 sps:$4 sm:$0xff]  }
  0x69   :  { %1914 = vmatprep.subr.bf16.mxu0 %v2695_v6  ;;  %v2779_v5 = vld [vmem:[%s3854_s1 + $0x684] ss:$8 sps:$4 sm:$0xff]   ;;  %v2774_v6 = vld [vmem:[%s3854_s1 + $0x280] ss:$8 sps:$4 sm:$0xff]  }
  0x6b   :  { %1751 = vmatpush1.bf16.msra.mxu1 %v2690_v7  ;;  %v2777_v7 = vld [vmem:[%s3854_s1 + $0x680] ss:$8 sps:$4 sm:$0xff]  }
  0x6c   :  { %1915 = vmatpush1.bf16.msra.mxu0 %v2693_v8  ;;  %1752 = vmatprep.subr.bf16.mxu1 %v2698_v9  ;;  %v2782_v8 = vld [vmem:[%s3854_s1 + $0x294] ss:$8 sps:$4 sm:$0xff]  }
  0x6d   :  { %1916 = vmatprep.subr.bf16.mxu0 %v2701_v10  ;;  %v2785_v9 = vld [vmem:[%s3854_s1 + $0x694] ss:$8 sps:$4 sm:$0xff]   ;;  %v2780_v10 = vld [vmem:[%s3854_s1 + $0x290] ss:$8 sps:$4 sm:$0xff]  }
  0x6f   :  { %1753 = vmatpush1.bf16.msra.mxu1 %v2696_v11  ;;  %v2783_v11 = vld [vmem:[%s3854_s1 + $0x690] ss:$8 sps:$4 sm:$0xff]  }
  0x70   :  { %1917 = vmatpush1.bf16.msra.mxu0 %v2699_v12  ;;  %1754 = vmatprep.subr.bf16.mxu1 %v2704_v13  ;;  %v2788_v12 = vld [vmem:[%s3854_s1 + $0x2a4] ss:$8 sps:$4 sm:$0xff]  }
  0x71   :  { %1918 = vmatprep.subr.bf16.mxu0 %v2707_v14  ;;  %v2791_v13 = vld [vmem:[%s3854_s1 + $0x6a4] ss:$8 sps:$4 sm:$0xff]   ;;  %v2786_v14 = vld [vmem:[%s3854_s1 + $0x2a0] ss:$8 sps:$4 sm:$0xff]  }
  0x73   :  { %1755 = vmatpush1.bf16.msra.mxu1 %v2702_v15  ;;  %v2789_v15 = vld [vmem:[%s3854_s1 + $0x6a0] ss:$8 sps:$4 sm:$0xff]  }
  0x74   :  { %1919 = vmatpush1.bf16.msra.mxu0 %v2705_v16  ;;  %1756 = vmatprep.subr.bf16.mxu1 %v2710_v17  ;;  %v2794_v16 = vld [vmem:[%s3854_s1 + $0x2b4] ss:$8 sps:$4 sm:$0xff]  }
  0x75   :  { %1920 = vmatprep.subr.bf16.mxu0 %v2713_v18  ;;  %v2797_v17 = vld [vmem:[%s3854_s1 + $0x6b4] ss:$8 sps:$4 sm:$0xff]   ;;  %v2792_v18 = vld [vmem:[%s3854_s1 + $0x2b0] ss:$8 sps:$4 sm:$0xff]  }
  0x77   :  { %1757 = vmatpush1.bf16.msra.mxu1 %v2708_v19  ;;  %v2795_v19 = vld [vmem:[%s3854_s1 + $0x6b0] ss:$8 sps:$4 sm:$0xff]  }
  0x78   :  { %1921 = vmatpush1.bf16.msra.mxu0 %v2711_v22  ;;  %1758 = vmatprep.subr.bf16.mxu1 %v2716_v23  ;;  %v2800_v22 = vld [vmem:[%s3854_s1 + $0x2c4] ss:$8 sps:$4 sm:$0xff]  }
  0x79   :  { %1922 = vmatprep.subr.bf16.mxu0 %v2719_v24  ;;  %v2803_v23 = vld [vmem:[%s3854_s1 + $0x6c4] ss:$8 sps:$4 sm:$0xff]   ;;  %v2798_v24 = vld [vmem:[%s3854_s1 + $0x2c0] ss:$8 sps:$4 sm:$0xff]  }
  0x7b   :  { %1759 = vmatpush1.bf16.msra.mxu1 %v2714_v25  ;;  %v2801_v25 = vld [vmem:[%s3854_s1 + $0x6c0] ss:$8 sps:$4 sm:$0xff]  }
  0x7c   :  { %1923 = vmatpush1.bf16.msra.mxu0 %v2717_v26  ;;  %1760 = vmatprep.subr.bf16.mxu1 %v2722_v27  ;;  %v2806_v26 = vld [vmem:[%s3854_s1 + $0x2d4] ss:$8 sps:$4 sm:$0xff]  }
  0x7d   :  { %1924 = vmatprep.subr.bf16.mxu0 %v2725_v31  ;;  %v2809_v27 = vld [vmem:[%s3854_s1 + $0x6d4] ss:$8 sps:$4 sm:$0xff]   ;;  %v2804_v31 = vld [vmem:[%s3854_s1 + $0x2d0] ss:$8 sps:$4 sm:$0xff]  }
  0x7f   :  { %1761 = vmatpush1.bf16.msra.mxu1 %v2720_v32  ;;  %v2807_v32 = vld [vmem:[%s3854_s1 + $0x6d0] ss:$8 sps:$4 sm:$0xff]  }
  0x80   :  { %1925 = vmatpush1.bf16.msra.mxu0 %v2723_v34  ;;  %1771 = vmatprep.subr.bf16.mxu1 %v2728_v35  ;;  %v2812_v34 = vld [vmem:[%s3854_s1 + $0x2e4] ss:$8 sps:$4 sm:$0xff]  }
  0x81   :  { %1935 = vmatprep.subr.bf16.mxu0 %v2731_v36  ;;  %v2815_v35 = vld [vmem:[%s3854_s1 + $0x6e4] ss:$8 sps:$4 sm:$0xff]   ;;  %v2810_v36 = vld [vmem:[%s3854_s1 + $0x2e0] ss:$8 sps:$4 sm:$0xff]  }
  0x82   :  { %1763 = vmatmul.mubr.bf16.vlgmr.msra.gmra.mrb[0].mxu1 %v340_v37  ;;  %v2813_v37 = vld [vmem:[%s3854_s1 + $0x6e0] ss:$8 sps:$4 sm:$0xff]  }
  0x83   :  { %1927 = vmatmul.mubr.bf16.vlgmr.msra.gmra.mrb[0].mxu0 %v389_v38  ;;  %1772 = vmatpush1.bf16.msra.mxu1 %v2726_v39  ;;  %v2818_v38 = vld [vmem:[%s3854_s1 + $0x2f4] ss:$8 sps:$4 sm:$0xff]  }
  0x84   :  { %1936 = vmatpush1.bf16.msra.mxu0 %v2729_v40  ;;  %1773 = vmatprep.subr.bf16.mxu1 %v2734_v41  ;;  %v2821_v39 = vld [vmem:[%s3854_s1 + $0x6f4] ss:$8 sps:$4 sm:$0xff]   ;;  %v2816_v40 = vld [vmem:[%s3854_s1 + $0x2f0] ss:$8 sps:$4 sm:$0xff]  }
  0x85   :  { %1937 = vmatprep.subr.bf16.mxu0 %v2737_v20  ;;  %1803 = vmatprep.mubr.bf16.mxu1 %v3206_v28  ;;  %v2819_v41 = vld [vmem:[%s3854_s1 + $0x6f0] ss:$8 sps:$4 sm:$0xff]   ;;  %v2824_v20 = vld [vmem:[%s3854_s1 + $0x304] ss:$8 sps:$4 sm:$0xff]  }
  0x86   :  { %1967 = vmatprep.mubr.bf16.mxu0 %v3209_v29 }
  0x87   :  { %1774 = vmatpush1.bf16.msra.mxu1 %v2732_v21  ;;  %v2827_v21 = vld [vmem:[%s3854_s1 + $0x704] ss:$8 sps:$4 sm:$0xff]  }
  0x88   :  { %1938 = vmatpush1.bf16.msra.mxu0 %v2735_v43  ;;  %1775 = vmatprep.subr.bf16.mxu1 %v2740_v44  ;;  %v2822_v43 = vld [vmem:[%s3854_s1 + $0x300] ss:$8 sps:$4 sm:$0xff]  }
  0x89   :  { %1939 = vmatprep.subr.bf16.mxu0 %v2743_v45  ;;  %v2825_v44 = vld [vmem:[%s3854_s1 + $0x700] ss:$8 sps:$4 sm:$0xff]   ;;  %v2830_v45 = vld [vmem:[%s3854_s1 + $0x314] ss:$8 sps:$4 sm:$0xff]  }
  0x8b   :  { %1776 = vmatpush1.bf16.msra.mxu1 %v2738_v46  ;;  %v2833_v46 = vld [vmem:[%s3854_s1 + $0x714] ss:$8 sps:$4 sm:$0xff]  }
  0x8c   :  { %1940 = vmatpush1.bf16.msra.mxu0 %v2741_v47  ;;  %1777 = vmatprep.subr.bf16.mxu1 %v2746_v48  ;;  %v343_v47 = vcombine.high %v3206_v28, %v3206_v28  ;;  %v392_v48 = vcombine.high %v3209_v29, %v3209_v29  ;;  %v2836_v28 = vld [vmem:[%s3854_s1 + $0x324] ss:$8 sps:$4 sm:$0xff]  }
  0x8d   :  { %1941 = vmatprep.subr.bf16.mxu0 %v2749_v49  ;;  %v2828_v49 = vld [vmem:[%s3854_s1 + $0x310] ss:$8 sps:$4 sm:$0xff]   ;;  %v2839_v29 = vld [vmem:[%s3854_s1 + $0x724] ss:$8 sps:$4 sm:$0xff]  }
  0x8f   :  { %1778 = vmatpush1.bf16.msra.mxu1 %v2744_v50  ;;  %v2831_v50 = vld [vmem:[%s3854_s1 + $0x710] ss:$8 sps:$4 sm:$0xff]  }
  0x90   :  { %1942 = vmatpush1.bf16.msra.mxu0 %v2747_v51  ;;  %1779 = vmatprep.subr.bf16.mxu1 %v2752_v52  ;;  %v2834_v51 = vld [vmem:[%s3854_s1 + $0x320] ss:$8 sps:$4 sm:$0xff]  }
  0x91   :  { %1943 = vmatprep.subr.bf16.mxu0 %v2755_v53  ;;  %v2837_v52 = vld [vmem:[%s3854_s1 + $0x720] ss:$8 sps:$4 sm:$0xff]   ;;  %v2842_v53 = vld [vmem:[%s3854_s1 + $0x334] ss:$8 sps:$4 sm:$0xff]  }
  0x93   :  { %1780 = vmatpush1.bf16.msra.mxu1 %v2750_v54  ;;  %v2845_v54 = vld [vmem:[%s3854_s1 + $0x734] ss:$8 sps:$4 sm:$0xff]  }
  0x94   :  { %1944 = vmatpush1.bf16.msra.mxu0 %v2753_v55  ;;  %1781 = vmatprep.subr.bf16.mxu1 %v2758_v56  ;;  %v2840_v55 = vld [vmem:[%s3854_s1 + $0x330] ss:$8 sps:$4 sm:$0xff]  }
  0x95   :  { %1945 = vmatprep.subr.bf16.mxu0 %v2761_v57  ;;  %v2843_v56 = vld [vmem:[%s3854_s1 + $0x730] ss:$8 sps:$4 sm:$0xff]   ;;  %v2848_v57 = vld [vmem:[%s3854_s1 + $0x344] ss:$8 sps:$4 sm:$0xff]  }
  0x97   :  { %1782 = vmatpush1.bf16.msra.mxu1 %v2756_v58  ;;  %v2851_v58 = vld [vmem:[%s3854_s1 + $0x744] ss:$8 sps:$4 sm:$0xff]  }
  0x98   :  { %1946 = vmatpush1.bf16.msra.mxu0 %v2759_v59  ;;  %1783 = vmatprep.subr.bf16.mxu1 %v2764_v60  ;;  %v2846_v59 = vld [vmem:[%s3854_s1 + $0x340] ss:$8 sps:$4 sm:$0xff]  }
  0x99   :  { %1947 = vmatprep.subr.bf16.mxu0 %v2767_v61  ;;  %v2849_v60 = vld [vmem:[%s3854_s1 + $0x740] ss:$8 sps:$4 sm:$0xff]   ;;  %v2854_v61 = vld [vmem:[%s3854_s1 + $0x354] ss:$8 sps:$4 sm:$0xff]  }
  0x9b   :  { %1784 = vmatpush1.bf16.msra.mxu1 %v2762_v62  ;;  %v2857_v62 = vld [vmem:[%s3854_s1 + $0x754] ss:$8 sps:$4 sm:$0xff]  }
  0x9c   :  { %1948 = vmatpush1.bf16.msra.mxu0 %v2765_v63  ;;  %1785 = vmatprep.subr.bf16.mxu1 %v2770_v0  ;;  %v2852_v63 = vld [vmem:[%s3854_s1 + $0x350] ss:$8 sps:$4 sm:$0xff]  }
  0x9d   :  { %1949 = vmatprep.subr.bf16.mxu0 %v2773_v1  ;;  %v2855_v0 = vld [vmem:[%s3854_s1 + $0x750] ss:$8 sps:$4 sm:$0xff]   ;;  %v2860_v1 = vld [vmem:[%s3854_s1 + $0x364] ss:$8 sps:$4 sm:$0xff]  }
  0x9f   :  { %1786 = vmatpush1.bf16.msra.mxu1 %v2768_v2  ;;  %v2863_v2 = vld [vmem:[%s3854_s1 + $0x764] ss:$8 sps:$4 sm:$0xff]  }
  0xa0   :  { %1950 = vmatpush1.bf16.msra.mxu0 %v2771_v3  ;;  %1787 = vmatprep.subr.bf16.mxu1 %v2776_v4  ;;  %v2858_v3 = vld [vmem:[%s3854_s1 + $0x360] ss:$8 sps:$4 sm:$0xff]  }
  0xa1   :  { %1951 = vmatprep.subr.bf16.mxu0 %v2779_v5  ;;  %v2861_v4 = vld [vmem:[%s3854_s1 + $0x760] ss:$8 sps:$4 sm:$0xff]   ;;  %v2866_v5 = vld [vmem:[%s3854_s1 + $0x374] ss:$8 sps:$4 sm:$0xff]  }
  0xa3   :  { %1788 = vmatpush1.bf16.msra.mxu1 %v2774_v6  ;;  %v2869_v6 = vld [vmem:[%s3854_s1 + $0x774] ss:$8 sps:$4 sm:$0xff]  }
  0xa4   :  { %1952 = vmatpush1.bf16.msra.mxu0 %v2777_v7  ;;  %1789 = vmatprep.subr.bf16.mxu1 %v2782_v8  ;;  %v2864_v7 = vld [vmem:[%s3854_s1 + $0x370] ss:$8 sps:$4 sm:$0xff]  }
  0xa5   :  { %1953 = vmatprep.subr.bf16.mxu0 %v2785_v9  ;;  %v2867_v8 = vld [vmem:[%s3854_s1 + $0x770] ss:$8 sps:$4 sm:$0xff]   ;;  %v2872_v9 = vld [vmem:[%s3854_s1 + $0x384] ss:$8 sps:$4 sm:$0xff]  }
  0xa7   :  { %1790 = vmatpush1.bf16.msra.mxu1 %v2780_v10  ;;  %v2875_v10 = vld [vmem:[%s3854_s1 + $0x784] ss:$8 sps:$4 sm:$0xff]  }
  0xa8   :  { %1954 = vmatpush1.bf16.msra.mxu0 %v2783_v11  ;;  %1791 = vmatprep.subr.bf16.mxu1 %v2788_v12  ;;  %v2870_v11 = vld [vmem:[%s3854_s1 + $0x380] ss:$8 sps:$4 sm:$0xff]  }
  0xa9   :  { %1955 = vmatprep.subr.bf16.mxu0 %v2791_v13  ;;  %v2873_v12 = vld [vmem:[%s3854_s1 + $0x780] ss:$8 sps:$4 sm:$0xff]   ;;  %v2878_v13 = vld [vmem:[%s3854_s1 + $0x394] ss:$8 sps:$4 sm:$0xff]  }
  0xab   :  { %1792 = vmatpush1.bf16.msra.mxu1 %v2786_v14  ;;  %v2881_v14 = vld [vmem:[%s3854_s1 + $0x794] ss:$8 sps:$4 sm:$0xff]  }
  0xac   :  { %1956 = vmatpush1.bf16.msra.mxu0 %v2789_v15  ;;  %1793 = vmatprep.subr.bf16.mxu1 %v2794_v16  ;;  %v2876_v15 = vld [vmem:[%s3854_s1 + $0x390] ss:$8 sps:$4 sm:$0xff]  }
  0xad   :  { %1957 = vmatprep.subr.bf16.mxu0 %v2797_v17  ;;  %v2879_v16 = vld [vmem:[%s3854_s1 + $0x790] ss:$8 sps:$4 sm:$0xff]   ;;  %v2884_v17 = vld [vmem:[%s3854_s1 + $0x3a4] ss:$8 sps:$4 sm:$0xff]  }
  0xaf   :  { %1794 = vmatpush1.bf16.msra.mxu1 %v2792_v18  ;;  %v2887_v18 = vld [vmem:[%s3854_s1 + $0x7a4] ss:$8 sps:$4 sm:$0xff]  }
  0xb0   :  { %1958 = vmatpush1.bf16.msra.mxu0 %v2795_v19  ;;  %1795 = vmatprep.subr.bf16.mxu1 %v2800_v22  ;;  %v2882_v19 = vld [vmem:[%s3854_s1 + $0x3a0] ss:$8 sps:$4 sm:$0xff]  }
  0xb1   :  { %1959 = vmatprep.subr.bf16.mxu0 %v2803_v23  ;;  %v2885_v22 = vld [vmem:[%s3854_s1 + $0x7a0] ss:$8 sps:$4 sm:$0xff]   ;;  %v2890_v23 = vld [vmem:[%s3854_s1 + $0x3b4] ss:$8 sps:$4 sm:$0xff]  }
  0xb3   :  { %1796 = vmatpush1.bf16.msra.mxu1 %v2798_v24  ;;  %v2893_v24 = vld [vmem:[%s3854_s1 + $0x7b4] ss:$8 sps:$4 sm:$0xff]  }
  0xb4   :  { %1960 = vmatpush1.bf16.msra.mxu0 %v2801_v25  ;;  %1797 = vmatprep.subr.bf16.mxu1 %v2806_v26  ;;  %v2888_v25 = vld [vmem:[%s3854_s1 + $0x3b0] ss:$8 sps:$4 sm:$0xff]  }
  0xb5   :  { %1961 = vmatprep.subr.bf16.mxu0 %v2809_v27  ;;  %v2891_v26 = vld [vmem:[%s3854_s1 + $0x7b0] ss:$8 sps:$4 sm:$0xff]   ;;  %v2896_v27 = vld [vmem:[%s3854_s1 + $0x3c4] ss:$8 sps:$4 sm:$0xff]  }
  0xb7   :  { %1798 = vmatpush1.bf16.msra.mxu1 %v2804_v31  ;;  %v2899_v31 = vld [vmem:[%s3854_s1 + $0x7c4] ss:$8 sps:$4 sm:$0xff]  }
  0xb8   :  { %1962 = vmatpush1.bf16.msra.mxu0 %v2807_v32  ;;  %1799 = vmatprep.subr.bf16.mxu1 %v2812_v34  ;;  %v2894_v32 = vld [vmem:[%s3854_s1 + $0x3c0] ss:$8 sps:$4 sm:$0xff]  }
  0xb9   :  { %1963 = vmatprep.subr.bf16.mxu0 %v2815_v35  ;;  %v2897_v34 = vld [vmem:[%s3854_s1 + $0x7c0] ss:$8 sps:$4 sm:$0xff]   ;;  %v2902_v35 = vld [vmem:[%s3854_s1 + $0x3d4] ss:$8 sps:$4 sm:$0xff]  }
  0xbb   :  { %1800 = vmatpush1.bf16.msra.mxu1 %v2810_v36  ;;  %v2905_v36 = vld [vmem:[%s3854_s1 + $0x7d4] ss:$8 sps:$4 sm:$0xff]  }
  0xbc   :  { %1964 = vmatpush1.bf16.msra.mxu0 %v2813_v37  ;;  %1801 = vmatprep.subr.bf16.mxu1 %v2818_v38  ;;  %v2900_v37 = vld [vmem:[%s3854_s1 + $0x3d0] ss:$8 sps:$4 sm:$0xff]  }
  0xbd   :  { %1965 = vmatprep.subr.bf16.mxu0 %v2821_v39  ;;  %v2903_v38 = vld [vmem:[%s3854_s1 + $0x7d0] ss:$8 sps:$4 sm:$0xff]   ;;  %v2908_v39 = vld [vmem:[%s3854_s1 + $0x3e4] ss:$8 sps:$4 sm:$0xff]  }
  0xbf   :  { %1802 = vmatpush1.bf16.msra.mxu1 %v2816_v40  ;;  %v2911_v40 = vld [vmem:[%s3854_s1 + $0x7e4] ss:$8 sps:$4 sm:$0xff]  }
  0xc0   :  { %1966 = vmatpush1.bf16.msra.mxu0 %v2819_v41  ;;  %1812 = vmatprep.subr.bf16.mxu1 %v2824_v20  ;;  %v2906_v41 = vld [vmem:[%s3854_s1 + $0x3e0] ss:$8 sps:$4 sm:$0xff]  }
  0xc1   :  { %1976 = vmatprep.subr.bf16.mxu0 %v2827_v21  ;;  %v2909_v20 = vld [vmem:[%s3854_s1 + $0x7e0] ss:$8 sps:$4 sm:$0xff]   ;;  %v2914_v21 = vld [vmem:[%s3854_s1 + $0x3f4] ss:$8 sps:$4 sm:$0xff]  }
  0xc2   :  { %1804 = vmatmul.mubr.bf16.vlgmr.msra.gmra.mrb[0].mxu1 %v3212_v30 }
  0xc3   :  { %1968 = vmatmul.mubr.bf16.vlgmr.msra.gmra.mrb[0].mxu0 %v3217_v33  ;;  %1813 = vmatpush1.bf16.msra.mxu1 %v2822_v43  ;;  %v2917_v43 = vld [vmem:[%s3854_s1 + $0x7f4] ss:$8 sps:$4 sm:$0xff]  }
  0xc4   :  { %1977 = vmatpush1.bf16.msra.mxu0 %v2825_v44  ;;  %1814 = vmatprep.subr.bf16.mxu1 %v2830_v45  ;;  %v2912_v44 = vld [vmem:[%s3854_s1 + $0x3f0] ss:$8 sps:$4 sm:$0xff]  }
  0xc5   :  { %1978 = vmatprep.subr.bf16.mxu0 %v2833_v46  ;;  %1844 = vmatprep.mubr.bf16.mxu1 %v343_v47  ;;  %v2915_v45 = vld [vmem:[%s3854_s1 + $0x7f0] ss:$8 sps:$4 sm:$0xff]   ;;  %v2918_v46 = vld [vmem:[%s3856_s3 + $0x40] sm:$0xff]   ;;  %v341_v47 = vcombine.high %v3212_v30, %v3212_v30  ;;  %v2921_v30 = vld [vmem:[%s3856_s3 + $0x8] sm:$0xff]  }
  0xc6   :  { %2008 = vmatprep.mubr.bf16.mxu0 %v392_v48  ;;  %v390_v48 = vcombine.high %v3217_v33, %v3217_v33  ;;  %v2922_v33 = vld [vmem:[%s3856_s3 + $0x50] sm:$0xff]  }
  0xc7   :  { %1815 = vmatpush1.bf16.msra.mxu1 %v2828_v49  ;;  %v2919_v49 = vld [vmem:[%s3856_s3] sm:$0xff]  }
  0xc8   :  { %1979 = vmatpush1.bf16.msra.mxu0 %v2831_v50  ;;  %1816 = vmatprep.subr.bf16.mxu1 %v2836_v28  ;;  %v2920_v50 = vld [vmem:[%s3856_s3 + $0x48] sm:$0xff]   ;;  %v2923_v28 = vld [vmem:[%s3856_s3 + $0x10] sm:$0xff]  }
  0xc9   :  { %1980 = vmatprep.subr.bf16.mxu0 %v2839_v29  ;;  %v2924_v29 = vld [vmem:[%s3856_s3 + $0x58] sm:$0xff]  }
  0xcb   :  { %1817 = vmatpush1.bf16.msra.mxu1 %v2834_v51  ;;  %v2925_v51 = vld [vmem:[%s3856_s3 + $0x18] sm:$0xff]  }
  0xcc   :  { %1981 = vmatpush1.bf16.msra.mxu0 %v2837_v52  ;;  %1818 = vmatprep.subr.bf16.mxu1 %v2842_v53  ;;  %v2926_v52 = vld [vmem:[%s3856_s3 + $0x60] sm:$0xff]  }
  0xcd   :  { %1982 = vmatprep.subr.bf16.mxu0 %v2845_v54  ;;  %v2927_v53 = vld [vmem:[%s3856_s3 + $0x20] sm:$0xff]   ;;  %v2928_v54 = vld [vmem:[%s3856_s3 + $0x68] sm:$0xff]  }
  0xcf   :  { %1819 = vmatpush1.bf16.msra.mxu1 %v2840_v55  ;;  %v2929_v55 = vld [vmem:[%s3856_s3 + $0x28] sm:$0xff]  }
  0xd0   :  { %1983 = vmatpush1.bf16.msra.mxu0 %v2843_v56  ;;  %1820 = vmatprep.subr.bf16.mxu1 %v2848_v57  ;;  %v2930_v56 = vld [vmem:[%s3856_s3 + $0x70] sm:$0xff]  }
  0xd1   :  { %1984 = vmatprep.subr.bf16.mxu0 %v2851_v58  ;;  %v2931_v57 = vld [vmem:[%s3856_s3 + $0x30] sm:$0xff]   ;;  %v2932_v58 = vld [vmem:[%s3856_s3 + $0x78] sm:$0xff]  }
  0xd3   :  { %1821 = vmatpush1.bf16.msra.mxu1 %v2846_v59  ;;  %v2933_v59 = vld [vmem:[%s3856_s3 + $0x38] sm:$0xff]  }
  0xd4   :  { %1985 = vmatpush1.bf16.msra.mxu0 %v2849_v60  ;;  %1822 = vmatprep.subr.bf16.mxu1 %v2854_v61  ;;  %v285_v60 = vsub.s32 0, %v3086_v42  ;;  %v281_v61 = vld [vmem:[%s3857_s2] sm:$0x3] }
  0xd5   :  { %1986 = vmatprep.subr.bf16.mxu0 %v2857_v62  ;;  %v289_v62 = vsub.s32 1, %v3086_v42  ;;  %v10_v42 = vstv %s3858_s4 }
  0xd6   :  { %11 = vst [vmem:[#allocation2] sm:$0x1] %v10_v42 }
  0xd7   :  { %1823 = vmatpush1.bf16.msra.mxu1 %v2852_v63  ;;  %v286_v63 = vrot.slane %v281_v61, %v285_v60 }
  0xd8   :  { %1987 = vmatpush1.bf16.msra.mxu0 %v2855_v0  ;;  %1824 = vmatprep.subr.bf16.mxu1 %v2860_v1  ;;  %v290_v0 = vrot.slane %v281_v61, %v289_v62 }
  0xd9   :  { %1988 = vmatprep.subr.bf16.mxu0 %v2863_v2 }
  0xdb   :  { %1825 = vmatpush1.bf16.msra.mxu1 %v2858_v3 }
  0xdc   :  { %1989 = vmatpush1.bf16.msra.mxu0 %v2861_v4  ;;  %1826 = vmatprep.subr.bf16.mxu1 %v2866_v5 }
  0xdd   :  { %1990 = vmatprep.subr.bf16.mxu0 %v2869_v6 }
  0xdf   :  { %1827 = vmatpush1.bf16.msra.mxu1 %v2864_v7 }
  0xe0   :  { %1991 = vmatpush1.bf16.msra.mxu0 %v2867_v8  ;;  %1828 = vmatprep.subr.bf16.mxu1 %v2872_v9 }
  0xe1   :  { %1992 = vmatprep.subr.bf16.mxu0 %v2875_v10 }
  0xe3   :  { %1829 = vmatpush1.bf16.msra.mxu1 %v2870_v11 }
  0xe4   :  { %1993 = vmatpush1.bf16.msra.mxu0 %v2873_v12  ;;  %1830 = vmatprep.subr.bf16.mxu1 %v2878_v13 }
  0xe5   :  { %1994 = vmatprep.subr.bf16.mxu0 %v2881_v14 }
  0xe7   :  { %1831 = vmatpush1.bf16.msra.mxu1 %v2876_v15 }
  0xe8   :  { %1995 = vmatpush1.bf16.msra.mxu0 %v2879_v16  ;;  %1832 = vmatprep.subr.bf16.mxu1 %v2884_v17 }
  0xe9   :  { %1996 = vmatprep.subr.bf16.mxu0 %v2887_v18  ;;  %v2464_v18 = vld [vmem:[#allocation2] ss:$0 sm:$0xff] }
  0xeb   :  { %1833 = vmatpush1.bf16.msra.mxu1 %v2882_v19 }
  0xec   :  { %1997 = vmatpush1.bf16.msra.mxu0 %v2885_v22  ;;  %1834 = vmatprep.subr.bf16.mxu1 %v2890_v23 }
  0xed   :  { %1998 = vmatprep.subr.bf16.mxu0 %v2893_v24 }
  0xef   :  { %1835 = vmatpush1.bf16.msra.mxu1 %v2888_v25 }
  0xf0   :  { %1999 = vmatpush1.bf16.msra.mxu0 %v2891_v26  ;;  %1836 = vmatprep.subr.bf16.mxu1 %v2896_v27 }
  0xf1   :  { %2000 = vmatprep.subr.bf16.mxu0 %v2899_v31 }
  0xf3   :  { %1837 = vmatpush1.bf16.msra.mxu1 %v2894_v32 }
  0xf4   :  { %2001 = vmatpush1.bf16.msra.mxu0 %v2897_v34  ;;  %1838 = vmatprep.subr.bf16.mxu1 %v2902_v35 }
  0xf5   :  { %2002 = vmatprep.subr.bf16.mxu0 %v2905_v36 }
  0xf7   :  { %1839 = vmatpush1.bf16.msra.mxu1 %v2900_v37 }
  0xf8   :  { %2003 = vmatpush1.bf16.msra.mxu0 %v2903_v38  ;;  %1840 = vmatprep.subr.bf16.mxu1 %v2908_v39 }
  0xf9   :  { %2004 = vmatprep.subr.bf16.mxu0 %v2911_v40 }
  0xfb   :  { %1841 = vmatpush1.bf16.msra.mxu1 %v2906_v41 }
  0xfc   :  { %2005 = vmatpush1.bf16.msra.mxu0 %v2909_v20  ;;  %1842 = vmatprep.subr.bf16.mxu1 %v2914_v21 }
  0xfd   :  { %2006 = vmatprep.subr.bf16.mxu0 %v2917_v43 }
  0xff   :  { %1843 = vmatpush1.bf16.msra.mxu1 %v2912_v44 }
 0x100   :  { %2007 = vmatpush1.bf16.msra.mxu0 %v2915_v45  ;;  %2481 = vmatprep.subr.bf16.mxu1 %v2918_v46 }
 0x102   :  { %1845 = vmatmul.mubr.bf16.vlgmr.msra.gmra.mrb[0].mxu1 %v341_v47 }
 0x103   :  { %2009 = vmatmul.mubr.bf16.vlgmr.msra.gmra.mrb[0].mxu0 %v390_v48  ;;  %2482 = vmatpush3.bf16.msra.mxu1 %v2919_v49 }
 0x104   :  { %2483 = vmatprep.subr.bf16.mxu1 %v2920_v50 }
 0x107   :  { %2484 = vmatpush3.bf16.msra.mxu1 %v2921_v30 }
 0x108   :  { %2485 = vmatprep.subr.bf16.mxu1 %v2922_v33 }
 0x10b   :  { %2486 = vmatpush3.bf16.msra.mxu1 %v2923_v28 }
 0x10c   :  { %2487 = vmatprep.subr.bf16.mxu1 %v2924_v29 }
 0x10f   :  { %2488 = vmatpush3.bf16.msra.mxu1 %v2925_v51 }
 0x110   :  { %2489 = vmatprep.subr.bf16.mxu1 %v2926_v52 }
 0x113   :  { %2490 = vmatpush3.bf16.msra.mxu1 %v2927_v53 }
 0x114   :  { %2491 = vmatprep.subr.bf16.mxu1 %v2928_v54 }
 0x117   :  { %2492 = vmatpush3.bf16.msra.mxu1 %v2929_v55 }
 0x118   :  { %2493 = vmatprep.subr.bf16.mxu1 %v2930_v56 }
 0x11b   :  { %2494 = vmatpush3.bf16.msra.mxu1 %v2931_v57 }
 0x11c   :  { %2495 = vmatprep.subr.bf16.mxu1 %v2932_v58 }
 0x11f   :  { %2496 = vmatpush3.bf16.msra.mxu1 %v2933_v59 }
 0x1d5   :  { %v1846_v1 = vpop.f32.mrb[0].mxu1 }
 0x1d6   :  { %v2010_v2 = vpop.f32.mrb[0].mxu0  ;;  %v2503_v3 = vadd.f32 %v1846_v1, %v286_v63  ;;  %v1848_v4 = vpop.f32.mrb[1].mxu1 }
 0x1d7   :  { %v2012_v5 = vpop.f32.mrb[1].mxu0  ;;  %v2505_v6 = vadd.f32 %v1848_v4, %v290_v0  ;;  %v1850_v7 = vpop.f32.mrb[2].mxu1 }
 0x1d8   :  { %v2014_v8 = vpop.f32.mrb[2].mxu0  ;;  %v2504_v9 = vadd.f32 %v2503_v3, %v2010_v2  ;;  %v1851_v10 = vpop.f32.mrb[3].mxu1 }
 0x1d9   :  { %v2015_v11 = vpop.f32.mrb[3].mxu0  ;;  %v2506_v12 = vadd.f32 %v2505_v6, %v2012_v5 }
 0x1da   :  { %v2017_v13 = vmax.f32 %v2504_v9, 0.0 }
 0x1db   :  { %v2018_v14 = vmax.f32 %v2506_v12, 0.0 }
 0x1dc   :  { %v2019_v16 = vpack.c.bf16 %v2017_v13, %v2017_v13 }
 0x1dd   :  { %v2020_v15 = vpack.c.bf16 %v2018_v14, %v2018_v14 }
 0x1df   :  { %2188 = vmatprep.mubr.bf16.mxu1 %v2020_v15 }
 0x1e0   :  { %2189 = vmatmul.mubr.bf16.vlgmr.msra.gmra.mrb[4].mxu1 %v2019_v16 }
 0x2b3   :  { %v2497_v17 = vpop.f32.mrb[4].mxu1 }
 0x2b4   :  { %v2498_v19 = vpop.f32.mrb[5].mxu1 }
 0x2b5   :  { %v2499_v22 = vadd.f32 %v2498_v19, %v2497_v17  ;;  %v2500_v23 = vpop.f32.mrb[6].mxu1 }
 0x2b6   :  { %v2501_v24 = vpop.f32.mrb[7].mxu1 }
 0x2b7   :  { %v2191_v25 = vadd.f32 %v2499_v22, %v2464_v18 }
 0x2b9   :  { %v2196_v26 = vsub.f32 0.0, %v2191_v25 }
 0x2bb   :  { %v2197_v27 = vmul.f32 1.442695, %v2196_v26 }
 0x2bd   :  { %2934 = vpow2.f32 %v2197_v27 }
 0x2c7   :  { %v2935_v31 = vpop.eup %2934 }
 0x2c8   :  { %v2199_v32 = vadd.f32 1.0, %v2935_v31 }
 0x2ca   :  { %2936 = vrcp.f32 %v2199_v32 }
 0x2d4   :  { %v2937_v34 = vpop.eup %2936 }
 0x2d5   :  { %2203 = vst.msk [vmem:[%s3859_s5] sm:$0x3] %vm2202_vm0, %v2937_v34 }

</bundles_post_ra>
